<compile_context>
chip_gen: v6e
topology: v6e:2x2x1
jax: 0.10.0
libtpu: 0.0.40
codegen_flags: <defaults>
</compile_context>

<pallas_src>
import functools
import math

import jax
import jax.numpy as jnp
from jax.experimental import pallas as pl
from jax.experimental.pallas import tpu as pltpu


def _vmem_limit_bytes():
    """Scoped-VMEM budget: ~3/4 of physical VMEM (128 MiB v5e/v6e -> 96 MiB,
    64 MiB v7x -> 48 MiB), with a conservative fallback."""
    try:
        cap = int(pltpu.get_tpu_info().vmem_capacity_bytes)
    except Exception:
        cap = 64 * 1024 * 1024
    return int(min(cap * 3 // 4, 96 * 1024 * 1024))


# ---------------------------------------------------------------------------
# Tiled (multi-output) linear projection kernel
#   y_i = x @ w_i   for all i, sharing one read of x per tile.
# ---------------------------------------------------------------------------

def _make_fused_linear_kernel(n_mats, compute_dtype):
    def kernel(*refs):
        x_ref = refs[0]
        w_refs = refs[1:1 + n_mats]
        o_refs = refs[1 + n_mats:1 + 2 * n_mats]
        acc_refs = refs[1 + 2 * n_mats:]
        k_idx = pl.program_id(2)

        @pl.when(k_idx == 0)
        def _init():
            for acc in acc_refs:
                acc[...] = jnp.zeros_like(acc)

        # Cast the activation tile in VMEM (avoids a separate wrapper-side
        # cast pass over x in HBM); weights are pre-cast once at prep time.
        x = x_ref[...].astype(compute_dtype)
        for w_ref, acc in zip(w_refs, acc_refs):
            acc[...] += jnp.dot(x, w_ref[...],
                                preferred_element_type=jnp.float32)

        @pl.when(k_idx == pl.num_programs(2) - 1)
        def _store():
            for o_ref, acc in zip(o_refs, acc_refs):
                o_ref[...] = acc[...].astype(o_ref.dtype)

    return kernel


def pallas_fused_linear(x, weights, *, out_dtype=jnp.float32,
                        compute_dtype=jnp.float32, tm=512, tn=512, tk=512):
    """x: [M, K]; weights: list of pre-transposed [K, N] matrices (ideally
    already in `compute_dtype`).  Returns a tuple of [M, N] arrays."""
    M, K = x.shape
    N = weights[0].shape[1]
    for w in weights:
        assert w.shape == (K, N)
    n_mats = len(weights)

    # Clamp tiles to the problem (demo shapes are tiny); real configs should
    # be multiples of 128 (512 reaches ~85% of HBM roofline on v5e/v6e).
    tm, tn, tk = min(tm, M), min(tn, N), min(tk, K)
    assert M % tm == 0 and N % tn == 0 and K % tk == 0, "demo requires even tiling"

    wc = [w if w.dtype == jnp.dtype(compute_dtype) else w.astype(compute_dtype)
          for w in weights]

    x_isz = jnp.dtype(x.dtype).itemsize
    w_isz = jnp.dtype(compute_dtype).itemsize
    o_isz = jnp.dtype(out_dtype).itemsize
    cost = pl.CostEstimate(
        flops=2 * M * N * K * n_mats,
        transcendentals=0,
        bytes_accessed=M * K * x_isz + n_mats * (K * N * w_isz + M * N * o_isz),
    )

    grid = (M // tm, N // tn, K // tk)
    x_spec = pl.BlockSpec((tm, tk), lambda i, j, k: (i, k))
    w_spec = pl.BlockSpec((tk, tn), lambda i, j, k: (k, j))
    o_spec = pl.BlockSpec((tm, tn), lambda i, j, k: (i, j))

    return pl.pallas_call(
        _make_fused_linear_kernel(n_mats, compute_dtype),
        out_shape=tuple(jax.ShapeDtypeStruct((M, N), out_dtype)
                        for _ in range(n_mats)),
        grid_spec=pltpu.PrefetchScalarGridSpec(
            num_scalar_prefetch=0,
            grid=grid,
            in_specs=[x_spec] + [w_spec] * n_mats,
            out_specs=tuple(o_spec for _ in range(n_mats)),
            scratch_shapes=[pltpu.VMEM((tm, tn), jnp.float32)
                            for _ in range(n_mats)],
        ),
        compiler_params=pltpu.CompilerParams(
            dimension_semantics=("parallel", "parallel", "arbitrary"),
            vmem_limit_bytes=_vmem_limit_bytes(),
        ),
        cost_estimate=cost,
    )(x, *wc)


# ---------------------------------------------------------------------------
# Fused attention kernel: whole batch + all heads per (q-block) step,
# flash-style online softmax over key blocks, lane-dense [B, S, H*Dk] output.
# ---------------------------------------------------------------------------

def _attention_kernel(q_ref, k_ref, v_ref, kmask_ref, bias_ref, o_ref,
                      m_sc, l_sc, acc_sc, *, num_heads, d_kv, compute_dtype):
    kv_idx = pl.program_id(1)

    @pl.when(kv_idx == 0)
    def _init():
        m_sc[...] = jnp.full_like(m_sc, -1e30)
        l_sc[...] = jnp.zeros_like(l_sc)
        acc_sc[...] = jnp.zeros_like(acc_sc)

    # Additive key-padding term, shared across heads and query rows:
    # 0 for valid keys, -10000 for padded keys (purely additive mask — the
    # multiplicative s*mask of the reference is redundant through softmax).
    neg = (kmask_ref[...].astype(jnp.float32) - 1.0) * 10000.0     # (B, 1, tkv)

    pv_parts = []
    alpha_parts = []
    # Static unroll over heads: head selection is a static lane slice; the
    # per-head partial results are merged into ONE full-width accumulator
    # update below (single unmasked store instead of H masked RMWs).
    # TODO(synk): for large head counts make heads a grid / inner-pipeline
    # axis (vreg pressure of the static unroll).
    for h in range(num_heads):
        lo = h * d_kv
        qh = q_ref[:, :, lo:lo + d_kv]                  # (B, tq,  Dk) (pre-scaled)
        kh = k_ref[:, :, lo:lo + d_kv]                  # (B, tkv, Dk)
        vh = v_ref[:, :, lo:lo + d_kv]                  # (B, tkv, Dk)
        bh = bias_ref[h].astype(jnp.float32)            # (tq, tkv), batch-shared

        # Contract the last dims directly (no explicit kh.T / XLU transpose).
        s = jax.lax.dot_general(
            qh, kh, dimension_numbers=(((2,), (2,)), ((0,), (0,))),
            preferred_element_type=jnp.float32)          # (B, tq, tkv)
        s = s + bh + neg                                 # additive bias + mask

        m_prev = m_sc[h]                                             # (B, tq, 1)
        m_new = jnp.maximum(m_prev, jnp.max(s, axis=-1, keepdims=True))
        alpha = jnp.exp(m_prev - m_new)                              # (B, tq, 1)
        p = jnp.exp(s - m_new)                                       # (B, tq, tkv)
        l_sc[h] = alpha * l_sc[h] + jnp.sum(p, axis=-1, keepdims=True)
        m_sc[h] = m_new

        pv = jax.lax.dot_general(
            p.astype(compute_dtype), vh,
            dimension_numbers=(((2,), (1,)), ((0,), (0,))),
            preferred_element_type=jnp.float32)                      # (B, tq, Dk)
        pv_parts.append(pv)
        alpha_parts.append(jnp.broadcast_to(alpha, alpha.shape[:-1] + (d_kv,)))

    # One full-width FMA + store on the resident accumulator.
    pv_full = jnp.concatenate(pv_parts, axis=-1)          # (B, tq, H*Dk)
    alpha_full = jnp.concatenate(alpha_parts, axis=-1)    # (B, tq, H*Dk)
    acc_sc[...] = alpha_full * acc_sc[...] + pv_full

    # TODO(synk): attention-prob dropout omitted (eval-mode identity).

    @pl.when(kv_idx == pl.num_programs(1) - 1)
    def _finalize():
        B, tq = l_sc.shape[1], l_sc.shape[2]
        inv_parts = [
            jnp.broadcast_to(pl.reciprocal(l_sc[h], approx=True), (B, tq, d_kv))
            for h in range(num_heads)
        ]
        inv_full = jnp.concatenate(inv_parts, axis=-1)    # (B, tq, H*Dk)
        o_ref[...] = (acc_sc[...] * inv_full).astype(o_ref.dtype)


def pallas_attention(q, k, v, key_mask, bias, *, num_heads, d_kv,
                     compute_dtype=jnp.float32, tq=512, tkv=512):
    """q/k/v: [B, S, H*Dk] (1/sqrt(Dk) already folded into q); key_mask:
    [B, 1, S] (1 = attend, 0 = padded); bias: [H, S, S].
    Returns the context as [B, S, H*Dk] in `compute_dtype`.

    Grid is (q-blocks, kv-blocks) with the whole batch and all heads resident
    per step: the bias tile is DMA'd exactly once per (qi, kv) and shared
    across the batch, q / output stay resident across the kv reduction, and
    the context is written lane-dense.  K/V VMEM scales with B — for large
    batch reduce tkv or tile the batch outside.  On v7x (64 MiB VMEM) prefer
    compute_dtype=bfloat16 and tq=tkv in the 128..256 range, and keep
    S // tq >= 2 so both TensorCores get work.
    """
    B, S, HD = q.shape
    assert HD == num_heads * d_kv
    tq, tkv = min(tq, S), min(tkv, S)
    assert S % tq == 0 and S % tkv == 0, "demo requires even tiling"
    grid = (S // tq, S // tkv)

    kernel = functools.partial(
        _attention_kernel, num_heads=num_heads, d_kv=d_kv,
        compute_dtype=compute_dtype)

    q_spec = pl.BlockSpec((B, tq, HD), lambda qi, kv: (0, qi, 0))
    kv_spec = pl.BlockSpec((B, tkv, HD), lambda qi, kv: (0, kv, 0))
    mask_spec = pl.BlockSpec((B, 1, tkv), lambda qi, kv: (0, 0, kv))
    bias_spec = pl.BlockSpec((num_heads, tq, tkv), lambda qi, kv: (0, qi, kv))
    out_spec = pl.BlockSpec((B, tq, HD), lambda qi, kv: (0, qi, 0))

    qkv_isz = jnp.dtype(q.dtype).itemsize
    bias_isz = jnp.dtype(bias.dtype).itemsize
    out_isz = jnp.dtype(compute_dtype).itemsize
    n_qblk = S // tq
    cost = pl.CostEstimate(
        flops=4 * B * num_heads * S * S * d_kv,
        transcendentals=B * num_heads * S * S,
        bytes_accessed=(B * S * HD * qkv_isz * (1 + 2 * n_qblk)   # q once, k/v per q-block
                        + num_heads * S * S * bias_isz            # bias once
                        + B * S * 4                               # key mask
                        + B * S * HD * out_isz),                  # context write
    )

    return pl.pallas_call(
        kernel,
        out_shape=jax.ShapeDtypeStruct((B, S, HD), compute_dtype),
        grid_spec=pltpu.PrefetchScalarGridSpec(
            num_scalar_prefetch=0,
            grid=grid,
            in_specs=[q_spec, kv_spec, kv_spec, mask_spec, bias_spec],
            out_specs=out_spec,
            scratch_shapes=[
                pltpu.VMEM((num_heads, B, tq, 1), jnp.float32),   # running max
                pltpu.VMEM((num_heads, B, tq, 1), jnp.float32),   # running denom
                pltpu.VMEM((B, tq, HD), jnp.float32),             # context accum
            ],
        ),
        compiler_params=pltpu.CompilerParams(
            dimension_semantics=("parallel", "arbitrary"),
            vmem_limit_bytes=_vmem_limit_bytes(),
        ),
        cost_estimate=cost,
    )(q, k, v, key_mask, bias)


# ---------------------------------------------------------------------------
# Relative position bias (glue: integer bucket math + small embedding gather)
# ---------------------------------------------------------------------------

def _relative_position_bucket(relative_position, bidirectional=True,
                              num_buckets=32, max_distance=128):
    relative_buckets = jnp.zeros_like(relative_position)
    if bidirectional:
        num_buckets //= 2
        relative_buckets = relative_buckets + (
            (relative_position > 0).astype(jnp.int32) * num_buckets
        )
        relative_position = jnp.abs(relative_position)
    else:
        relative_position = -jnp.minimum(
            relative_position, jnp.zeros_like(relative_position)
        )
    max_exact = num_buckets // 2
    is_small = relative_position < max_exact
    rp_safe = jnp.maximum(relative_position, 1).astype(jnp.float32)
    rp_if_large = max_exact + (
        jnp.log(rp_safe / max_exact)
        / math.log(max_distance / max_exact)
        * (num_buckets - max_exact)
    ).astype(jnp.int32)
    rp_if_large = jnp.minimum(rp_if_large, num_buckets - 1)
    relative_buckets = relative_buckets + jnp.where(
        is_small, relative_position, rp_if_large
    )
    return relative_buckets


def compute_bias(rel_bias_weight, query_length, key_length, is_decoder,
                 num_buckets):
    context_position = jnp.arange(query_length, dtype=jnp.int32)[:, None]
    memory_position = jnp.arange(key_length, dtype=jnp.int32)[None, :]
    relative_position = memory_position - context_position
    buckets = _relative_position_bucket(
        relative_position, bidirectional=not is_decoder, num_buckets=num_buckets
    )
    values = rel_bias_weight[buckets]                      # (q, k, H)
    values = jnp.transpose(values, (2, 0, 1))[None, ...]   # (1, H, q, k)
    return values


# ---------------------------------------------------------------------------
# One-time parameter preparation (hoisted out of the forward hot path)
# ---------------------------------------------------------------------------

def prepare_kernel_params(params, *, d_kv, attn_scale=True,
                          compute_dtype=jnp.float32):
    """Pre-transpose nn.Linear weights to [in, out], fold 1/sqrt(d_kv) into
    the Q weight, and pre-cast to the MXU compute dtype — done once."""
    scale = 1.0 / math.sqrt(d_kv) if attn_scale else 1.0
    return {
        "wq": (params["q"].T * scale).astype(compute_dtype),
        "wk": params["k"].T.astype(compute_dtype),
        "wv": params["v"].T.astype(compute_dtype),
        "wo": params["o"].T.astype(compute_dtype),
        "rel_bias": params["rel_bias"].astype(jnp.float32),
    }


# ---------------------------------------------------------------------------
# ParallelAttention forward (self-attention, encoder, with relative bias)
# ---------------------------------------------------------------------------

def parallel_attention_forward(kparams, hidden_states, attention_mask, *,
                               num_heads, d_kv, is_decoder=False,
                               num_buckets=32, compute_dtype=jnp.float32):
    B, S, D = hidden_states.shape
    HD = num_heads * d_kv

    x2d = hidden_states.reshape(B * S, D)

    # Fused Q/K/V projection: one pallas_call, x read once, three outputs,
    # emitted directly in the attention compute dtype.
    q2d, k2d, v2d = pallas_fused_linear(
        x2d, [kparams["wq"], kparams["wk"], kparams["wv"]],
        out_dtype=compute_dtype, compute_dtype=compute_dtype)
    q = q2d.reshape(B, S, HD)
    k = k2d.reshape(B, S, HD)
    v = v2d.reshape(B, S, HD)

    # The module returns position_bias, so the [1, H, S, S] slab is
    # materialized once here (and reused — not recomputed — by the kernel,
    # which reads each tile exactly once thanks to the batch-in-block grid).
    position_bias = compute_bias(
        kparams["rel_bias"], S, S, is_decoder, num_buckets
    ).astype(jnp.float32)                                   # (1, H, S, S)
    bias3 = position_bias[0].astype(compute_dtype)          # (H, S, S)

    # Reduce the [B, 1, S, S] multiplicative mask to a [B, 1, S] key-padding
    # mask (encoder padding masks are query-independent).
    # TODO(synk): query-dependent attention masks would need the full slab.
    key_mask = attention_mask[:, 0, 0, :].reshape(B, 1, S).astype(jnp.float32)

    # Heads split / merged inside the kernel; output is already [B, S, H*Dk]
    # in compute_dtype and is fed to the O projection without re-casting.
    context = pallas_attention(
        q, k, v, key_mask, bias3,
        num_heads=num_heads, d_kv=d_kv, compute_dtype=compute_dtype)

    ctx2d = context.reshape(B * S, HD)
    (attn2d,) = pallas_fused_linear(
        ctx2d, [kparams["wo"]], out_dtype=jnp.float32,
        compute_dtype=compute_dtype)
    attn_output = attn2d.reshape(B, S, D)
    # TODO(synk): output dropout omitted (eval-mode identity).

    present_key_value_state = None  # is_decoder=False
    return (attn_output, present_key_value_state, position_bias, None)


# ---------------------------------------------------------------------------
# Pure-JAX reference (faithful port of the PyTorch module) for validation
# ---------------------------------------------------------------------------

def reference_forward(params, hidden_states, attention_mask, *,
                      num_heads, d_kv, attn_scale=True, is_decoder=False,
                      num_buckets=32):
    B, S, D = hidden_states.shape
    q = hidden_states @ params["q"].T
    k = hidden_states @ params["k"].T
    v = hidden_states @ params["v"].T

    def to_heads(t):
        return jnp.transpose(t.reshape(B, S, num_heads, d_kv), (0, 2, 1, 3))

    q_h, k_h, v_h = to_heads(q), to_heads(k), to_heads(v)
    scores = jnp.einsum("bhqd,bhkd->bhqk", q_h, k_h)
    if attn_scale:
        scores = scores / math.sqrt(d_kv)
    bias = compute_bias(params["rel_bias"], S, S, is_decoder, num_buckets)
    mask = attention_mask.astype(jnp.float32)
    scores = scores * mask + (-10000.0 * (1.0 - mask) + bias)
    probs = jax.nn.softmax(scores, axis=-1)
    ctx = jnp.einsum("bhqk,bhkd->bhqd", probs, v_h)
    ctx = jnp.transpose(ctx, (0, 2, 1, 3)).reshape(B, S, num_heads * d_kv)
    return ctx @ params["o"].T


# ---------------------------------------------------------------------------
# Main
# ---------------------------------------------------------------------------

if __name__ == "__main__":
    # Small EVA-like config
    B, S = 2, 8
    d_model = 32
    num_heads = 4
    d_kv = 8
    d_attn_out = num_heads * d_kv
    num_buckets = 32

    key = jax.random.PRNGKey(0)
    ks = jax.random.split(key, 7)

    params = {
        "q": 0.02 * jax.random.normal(ks[0], (d_attn_out, d_model), jnp.float32),
        "k": 0.02 * jax.random.normal(ks[1], (d_attn_out, d_model), jnp.float32),
        "v": 0.02 * jax.random.normal(ks[2], (d_attn_out, d_model), jnp.float32),
        "o": 0.02 * jax.random.normal(ks[3], (d_model, d_attn_out), jnp.float32),
        "rel_bias": 0.02 * jax.random.normal(ks[4], (num_buckets, num_heads),
                                             jnp.float32),
    }

    hidden_states = jax.random.normal(ks[5], (B, S, d_model), jnp.float32)

    # attention_mask: [B, 1, S, S]; batch 0 attends to all 8 keys, batch 1 to 6.
    lengths = jnp.array([8, 6], dtype=jnp.int32)
    key_pos = jnp.arange(S, dtype=jnp.int32)
    attention_mask = (key_pos[None, :] < lengths[:, None]).astype(jnp.float32)
    attention_mask = jnp.broadcast_to(
        attention_mask[:, None, None, :], (B, 1, S, S)
    )

    ref = reference_forward(
        params, hidden_states, attention_mask,
        num_heads=num_heads, d_kv=d_kv, attn_scale=True,
        is_decoder=False, num_buckets=num_buckets,
    )

    # 1) f32 MXU operands (reference-accuracy path).
    kparams_f32 = prepare_kernel_params(
        params, d_kv=d_kv, attn_scale=True, compute_dtype=jnp.float32)
    fwd_f32 = jax.jit(functools.partial(
        parallel_attention_forward, num_heads=num_heads, d_kv=d_kv,
        is_decoder=False, num_buckets=num_buckets, compute_dtype=jnp.float32))
    outputs = fwd_f32(kparams_f32, hidden_states, attention_mask)
    attn_output = jax.block_until_ready(outputs[0])
    assert attn_output.shape == (B, S, d_model)
    assert bool(jnp.allclose(attn_output, ref, atol=1e-3, rtol=1e-3)), \
        "f32 path mismatch vs reference"

    # 2) bf16 MXU operands with f32 accumulation (v6e/v7x peak-rate config).
    kparams_bf16 = prepare_kernel_params(
        params, d_kv=d_kv, attn_scale=True, compute_dtype=jnp.bfloat16)
    fwd_bf16 = jax.jit(functools.partial(
        parallel_attention_forward, num_heads=num_heads, d_kv=d_kv,
        is_decoder=False, num_buckets=num_buckets, compute_dtype=jnp.bfloat16))
    outputs_bf16 = fwd_bf16(kparams_bf16, hidden_states, attention_mask)
    attn_output_bf16 = jax.block_until_ready(outputs_bf16[0])
    assert attn_output_bf16.shape == (B, S, d_model)
    assert bool(jnp.allclose(attn_output_bf16, ref, atol=5e-3, rtol=5e-2)), \
        "bf16 path mismatch vs reference"

    print("KERNEL_OK")
</pallas_src>

<mosaic_0001>
module attributes {stable_mosaic.version = 11 : i64} {
  func.func @kernel(%arg0: i32, %arg1: i32, %arg2: i32, %arg3: memref<16x32xf32, #tpu.memory_space<vmem>>, %arg4: memref<32x32xf32, #tpu.memory_space<vmem>>, %arg5: memref<32x32xf32, #tpu.memory_space<vmem>>, %arg6: memref<32x32xf32, #tpu.memory_space<vmem>>, %arg7: memref<16x32xf32, #tpu.memory_space<vmem>>, %arg8: memref<16x32xf32, #tpu.memory_space<vmem>>, %arg9: memref<16x32xf32, #tpu.memory_space<vmem>>, %arg10: memref<16x32xf32, #tpu.memory_space<vmem>>, %arg11: memref<16x32xf32, #tpu.memory_space<vmem>>, %arg12: memref<16x32xf32, #tpu.memory_space<vmem>>) attributes {dimension_semantics = [#tpu.dimension_semantics<parallel>, #tpu.dimension_semantics<parallel>, #tpu.dimension_semantics<arbitrary>], iteration_bounds = array<i64: 1, 1, 1>, scalar_prefetch = 0 : i64, scratch_operands = 3 : i64, tpu.core_type = #tpu.core_type<tc>, window_params = [{transform_indices = @transform_0, window_bounds = array<i64: 16, 32>}, {transform_indices = @transform_1, window_bounds = array<i64: 32, 32>}, {transform_indices = @transform_2, window_bounds = array<i64: 32, 32>}, {transform_indices = @transform_3, window_bounds = array<i64: 32, 32>}, {transform_indices = @transform_4, window_bounds = array<i64: 16, 32>}, {transform_indices = @transform_5, window_bounds = array<i64: 16, 32>}, {transform_indices = @transform_6, window_bounds = array<i64: 16, 32>}]} {
    %c0_i32 = arith.constant 0 : i32
    %0 = arith.cmpi eq, %arg2, %c0_i32 : i32
    %1 = arith.extui %0 : i1 to i32
    %c0_i32_0 = arith.constant 0 : i32
    %2 = arith.cmpi ne, %1, %c0_i32_0 : i32
    scf.if %2 {
      %cst_24 = arith.constant 0.000000e+00 : f32
      %22 = vector.broadcast %cst_24 : f32 to vector<16x32xf32>
      %c0_25 = arith.constant 0 : index
      %c0_26 = arith.constant 0 : index
      %23 = vector.load %arg10[%c0_25, %c0_26] : memref<16x32xf32, #tpu.memory_space<vmem>>, vector<16x32xf32>
      tpu.vector_store %arg10[%c0_25, %c0_26], %22 {strides = array<i32>} : memref<16x32xf32, #tpu.memory_space<vmem>>, vector<16x32xf32>,
      %cst_27 = arith.constant 0.000000e+00 : f32
      %24 = vector.broadcast %cst_27 : f32 to vector<16x32xf32>
      %c0_28 = arith.constant 0 : index
      %c0_29 = arith.constant 0 : index
      %25 = vector.load %arg11[%c0_28, %c0_29] : memref<16x32xf32, #tpu.memory_space<vmem>>, vector<16x32xf32>
      tpu.vector_store %arg11[%c0_28, %c0_29], %24 {strides = array<i32>} : memref<16x32xf32, #tpu.memory_space<vmem>>, vector<16x32xf32>,
      %cst_30 = arith.constant 0.000000e+00 : f32
      %26 = vector.broadcast %cst_30 : f32 to vector<16x32xf32>
      %c0_31 = arith.constant 0 : index
      %c0_32 = arith.constant 0 : index
      %27 = vector.load %arg12[%c0_31, %c0_32] : memref<16x32xf32, #tpu.memory_space<vmem>>, vector<16x32xf32>
      tpu.vector_store %arg12[%c0_31, %c0_32], %26 {strides = array<i32>} : memref<16x32xf32, #tpu.memory_space<vmem>>, vector<16x32xf32>,
    } else {
    }
    %c0 = arith.constant 0 : index
    %c0_1 = arith.constant 0 : index
    %3 = vector.load %arg3[%c0, %c0_1] : memref<16x32xf32, #tpu.memory_space<vmem>>, vector<16x32xf32>
    %c0_2 = arith.constant 0 : index
    %c0_3 = arith.constant 0 : index
    %4 = vector.load %arg10[%c0_2, %c0_3] : memref<16x32xf32, #tpu.memory_space<vmem>>, vector<16x32xf32>
    %c0_4 = arith.constant 0 : index
    %c0_5 = arith.constant 0 : index
    %5 = vector.load %arg4[%c0_4, %c0_5] : memref<32x32xf32, #tpu.memory_space<vmem>>, vector<32x32xf32>
    %cst = arith.constant dense<0.000000e+00> : vector<16x32xf32>
    %6 = tpu.matmul %3, %5, %cst {dimension_numbers = #tpu.dot_dimension_numbers<[1], [0], [0], [1], [0, 0, 1, 1], [], []>} : vector<16x32xf32>, vector<32x32xf32>, vector<16x32xf32> -> vector<16x32xf32>
    %7 = arith.addf %4, %6 : vector<16x32xf32>
    %c0_6 = arith.constant 0 : index
    %c0_7 = arith.constant 0 : index
    %8 = vector.load %arg10[%c0_6, %c0_7] : memref<16x32xf32, #tpu.memory_space<vmem>>, vector<16x32xf32>
    tpu.vector_store %arg10[%c0_6, %c0_7], %7 {strides = array<i32>} : memref<16x32xf32, #tpu.memory_space<vmem>>, vector<16x32xf32>,
    %c0_8 = arith.constant 0 : index
    %c0_9 = arith.constant 0 : index
    %9 = vector.load %arg11[%c0_8, %c0_9] : memref<16x32xf32, #tpu.memory_space<vmem>>, vector<16x32xf32>
    %c0_10 = arith.constant 0 : index
    %c0_11 = arith.constant 0 : index
    %10 = vector.load %arg5[%c0_10, %c0_11] : memref<32x32xf32, #tpu.memory_space<vmem>>, vector<32x32xf32>
    %cst_12 = arith.constant dense<0.000000e+00> : vector<16x32xf32>
    %11 = tpu.matmul %3, %10, %cst_12 {dimension_numbers = #tpu.dot_dimension_numbers<[1], [0], [0], [1], [0, 0, 1, 1], [], []>} : vector<16x32xf32>, vector<32x32xf32>, vector<16x32xf32> -> vector<16x32xf32>
    %12 = arith.addf %9, %11 : vector<16x32xf32>
    %c0_13 = arith.constant 0 : index
    %c0_14 = arith.constant 0 : index
    %13 = vector.load %arg11[%c0_13, %c0_14] : memref<16x32xf32, #tpu.memory_space<vmem>>, vector<16x32xf32>
    tpu.vector_store %arg11[%c0_13, %c0_14], %12 {strides = array<i32>} : memref<16x32xf32, #tpu.memory_space<vmem>>, vector<16x32xf32>,
    %c0_15 = arith.constant 0 : index
    %c0_16 = arith.constant 0 : index
    %14 = vector.load %arg12[%c0_15, %c0_16] : memref<16x32xf32, #tpu.memory_space<vmem>>, vector<16x32xf32>
    %c0_17 = arith.constant 0 : index
    %c0_18 = arith.constant 0 : index
    %15 = vector.load %arg6[%c0_17, %c0_18] : memref<32x32xf32, #tpu.memory_space<vmem>>, vector<32x32xf32>
    %cst_19 = arith.constant dense<0.000000e+00> : vector<16x32xf32>
    %16 = tpu.matmul %3, %15, %cst_19 {dimension_numbers = #tpu.dot_dimension_numbers<[1], [0], [0], [1], [0, 0, 1, 1], [], []>} : vector<16x32xf32>, vector<32x32xf32>, vector<16x32xf32> -> vector<16x32xf32>
    %17 = arith.addf %14, %16 : vector<16x32xf32>
    %c0_20 = arith.constant 0 : index
    %c0_21 = arith.constant 0 : index
    %18 = vector.load %arg12[%c0_20, %c0_21] : memref<16x32xf32, #tpu.memory_space<vmem>>, vector<16x32xf32>
    tpu.vector_store %arg12[%c0_20, %c0_21], %17 {strides = array<i32>} : memref<16x32xf32, #tpu.memory_space<vmem>>, vector<16x32xf32>,
    %c0_i32_22 = arith.constant 0 : i32
    %19 = arith.cmpi eq, %arg2, %c0_i32_22 : i32
    %20 = arith.extui %19 : i1 to i32
    %c0_i32_23 = arith.constant 0 : i32
    %21 = arith.cmpi ne, %20, %c0_i32_23 : i32
    scf.if %21 {
      %c0_24 = arith.constant 0 : index
      %c0_25 = arith.constant 0 : index
      %22 = vector.load %arg10[%c0_24, %c0_25] : memref<16x32xf32, #tpu.memory_space<vmem>>, vector<16x32xf32>
      %c0_26 = arith.constant 0 : index
      %c0_27 = arith.constant 0 : index
      %23 = vector.load %arg7[%c0_26, %c0_27] : memref<16x32xf32, #tpu.memory_space<vmem>>, vector<16x32xf32>
      tpu.vector_store %arg7[%c0_26, %c0_27], %22 {strides = array<i32>} : memref<16x32xf32, #tpu.memory_space<vmem>>, vector<16x32xf32>,
      %c0_28 = arith.constant 0 : index
      %c0_29 = arith.constant 0 : index
      %24 = vector.load %arg11[%c0_28, %c0_29] : memref<16x32xf32, #tpu.memory_space<vmem>>, vector<16x32xf32>
      %c0_30 = arith.constant 0 : index
      %c0_31 = arith.constant 0 : index
      %25 = vector.load %arg8[%c0_30, %c0_31] : memref<16x32xf32, #tpu.memory_space<vmem>>, vector<16x32xf32>
      tpu.vector_store %arg8[%c0_30, %c0_31], %24 {strides = array<i32>} : memref<16x32xf32, #tpu.memory_space<vmem>>, vector<16x32xf32>,
      %c0_32 = arith.constant 0 : index
      %c0_33 = arith.constant 0 : index
      %26 = vector.load %arg12[%c0_32, %c0_33] : memref<16x32xf32, #tpu.memory_space<vmem>>, vector<16x32xf32>
      %c0_34 = arith.constant 0 : index
      %c0_35 = arith.constant 0 : index
      %27 = vector.load %arg9[%c0_34, %c0_35] : memref<16x32xf32, #tpu.memory_space<vmem>>, vector<16x32xf32>
      tpu.vector_store %arg9[%c0_34, %c0_35], %26 {strides = array<i32>} : memref<16x32xf32, #tpu.memory_space<vmem>>, vector<16x32xf32>,
    } else {
    }
    return
  }
  func.func @transform_0(%arg0: i32, %arg1: i32, %arg2: i32) -> (i32, i32) {
    %c0_i32 = arith.constant 0 : i32
    return %arg0, %arg2 : i32, i32
  }
  func.func @transform_1(%arg0: i32, %arg1: i32, %arg2: i32) -> (i32, i32) {
    %c0_i32 = arith.constant 0 : i32
    return %arg2, %arg1 : i32, i32
  }
  func.func @transform_2(%arg0: i32, %arg1: i32, %arg2: i32) -> (i32, i32) {
    %c0_i32 = arith.constant 0 : i32
    return %arg2, %arg1 : i32, i32
  }
  func.func @transform_3(%arg0: i32, %arg1: i32, %arg2: i32) -> (i32, i32) {
    %c0_i32 = arith.constant 0 : i32
    return %arg2, %arg1 : i32, i32
  }
  func.func @transform_4(%arg0: i32, %arg1: i32, %arg2: i32) -> (i32, i32) {
    %c0_i32 = arith.constant 0 : i32
    return %arg0, %arg1 : i32, i32
  }
  func.func @transform_5(%arg0: i32, %arg1: i32, %arg2: i32) -> (i32, i32) {
    %c0_i32 = arith.constant 0 : i32
    return %arg0, %arg1 : i32, i32
  }
  func.func @transform_6(%arg0: i32, %arg1: i32, %arg2: i32) -> (i32, i32) {
    %c0_i32 = arith.constant 0 : i32
    return %arg0, %arg1 : i32, i32
  }
}

module attributes {stable_mosaic.version = 11 : i64} {
  func.func @kernel(%arg0: i32, %arg1: i32, %arg2: i32, %arg3: memref<16x32xf32, #tpu.memory_space<vmem>>, %arg4: memref<32x32xf32, #tpu.memory_space<vmem>>, %arg5: memref<16x32xf32, #tpu.memory_space<vmem>>, %arg6: memref<16x32xf32, #tpu.memory_space<vmem>>) attributes {dimension_semantics = [#tpu.dimension_semantics<parallel>, #tpu.dimension_semantics<parallel>, #tpu.dimension_semantics<arbitrary>], iteration_bounds = array<i64: 1, 1, 1>, scalar_prefetch = 0 : i64, scratch_operands = 1 : i64, tpu.core_type = #tpu.core_type<tc>, window_params = [{transform_indices = @transform_0, window_bounds = array<i64: 16, 32>}, {transform_indices = @transform_1, window_bounds = array<i64: 32, 32>}, {transform_indices = @transform_2, window_bounds = array<i64: 16, 32>}]} {
    %c0_i32 = arith.constant 0 : i32
    %0 = arith.cmpi eq, %arg2, %c0_i32 : i32
    %1 = arith.extui %0 : i1 to i32
    %c0_i32_0 = arith.constant 0 : i32
    %2 = arith.cmpi ne, %1, %c0_i32_0 : i32
    scf.if %2 {
      %cst_10 = arith.constant 0.000000e+00 : f32
      %12 = vector.broadcast %cst_10 : f32 to vector<16x32xf32>
      %c0_11 = arith.constant 0 : index
      %c0_12 = arith.constant 0 : index
      %13 = vector.load %arg6[%c0_11, %c0_12] : memref<16x32xf32, #tpu.memory_space<vmem>>, vector<16x32xf32>
      tpu.vector_store %arg6[%c0_11, %c0_12], %12 {strides = array<i32>} : memref<16x32xf32, #tpu.memory_space<vmem>>, vector<16x32xf32>,
    } else {
    }
    %c0 = arith.constant 0 : index
    %c0_1 = arith.constant 0 : index
    %3 = vector.load %arg3[%c0, %c0_1] : memref<16x32xf32, #tpu.memory_space<vmem>>, vector<16x32xf32>
    %c0_2 = arith.constant 0 : index
    %c0_3 = arith.constant 0 : index
    %4 = vector.load %arg6[%c0_2, %c0_3] : memref<16x32xf32, #tpu.memory_space<vmem>>, vector<16x32xf32>
    %c0_4 = arith.constant 0 : index
    %c0_5 = arith.constant 0 : index
    %5 = vector.load %arg4[%c0_4, %c0_5] : memref<32x32xf32, #tpu.memory_space<vmem>>, vector<32x32xf32>
    %cst = arith.constant dense<0.000000e+00> : vector<16x32xf32>
    %6 = tpu.matmul %3, %5, %cst {dimension_numbers = #tpu.dot_dimension_numbers<[1], [0], [0], [1], [0, 0, 1, 1], [], []>} : vector<16x32xf32>, vector<32x32xf32>, vector<16x32xf32> -> vector<16x32xf32>
    %7 = arith.addf %4, %6 : vector<16x32xf32>
    %c0_6 = arith.constant 0 : index
    %c0_7 = arith.constant 0 : index
    %8 = vector.load %arg6[%c0_6, %c0_7] : memref<16x32xf32, #tpu.memory_space<vmem>>, vector<16x32xf32>
    tpu.vector_store %arg6[%c0_6, %c0_7], %7 {strides = array<i32>} : memref<16x32xf32, #tpu.memory_space<vmem>>, vector<16x32xf32>,
    %c0_i32_8 = arith.constant 0 : i32
    %9 = arith.cmpi eq, %arg2, %c0_i32_8 : i32
    %10 = arith.extui %9 : i1 to i32
    %c0_i32_9 = arith.constant 0 : i32
    %11 = arith.cmpi ne, %10, %c0_i32_9 : i32
    scf.if %11 {
      %c0_10 = arith.constant 0 : index
      %c0_11 = arith.constant 0 : index
      %12 = vector.load %arg6[%c0_10, %c0_11] : memref<16x32xf32, #tpu.memory_space<vmem>>, vector<16x32xf32>
      %c0_12 = arith.constant 0 : index
      %c0_13 = arith.constant 0 : index
      %13 = vector.load %arg5[%c0_12, %c0_13] : memref<16x32xf32, #tpu.memory_space<vmem>>, vector<16x32xf32>
      tpu.vector_store %arg5[%c0_12, %c0_13], %12 {strides = array<i32>} : memref<16x32xf32, #tpu.memory_space<vmem>>, vector<16x32xf32>,
    } else {
    }
    return
  }
  func.func @transform_0(%arg0: i32, %arg1: i32, %arg2: i32) -> (i32, i32) {
    %c0_i32 = arith.constant 0 : i32
    return %arg0, %arg2 : i32, i32
  }
  func.func @transform_1(%arg0: i32, %arg1: i32, %arg2: i32) -> (i32, i32) {
    %c0_i32 = arith.constant 0 : i32
    return %arg2, %arg1 : i32, i32
  }
  func.func @transform_2(%arg0: i32, %arg1: i32, %arg2: i32) -> (i32, i32) {
    %c0_i32 = arith.constant 0 : i32
    return %arg0, %arg1 : i32, i32
  }
}

module attributes {stable_mosaic.version = 11 : i64} {
  func.func @_attention_kernel(%arg0: i32, %arg1: i32, %arg2: memref<2x8x32xf32, #tpu.memory_space<vmem>>, %arg3: memref<2x8x32xf32, #tpu.memory_space<vmem>>, %arg4: memref<2x8x32xf32, #tpu.memory_space<vmem>>, %arg5: memref<2x1x8xf32, #tpu.memory_space<vmem>>, %arg6: memref<4x8x8xf32, #tpu.memory_space<vmem>>, %arg7: memref<2x8x32xf32, #tpu.memory_space<vmem>>, %arg8: memref<4x2x8x1xf32, #tpu.memory_space<vmem>>, %arg9: memref<4x2x8x1xf32, #tpu.memory_space<vmem>>, %arg10: memref<2x8x32xf32, #tpu.memory_space<vmem>>) attributes {dimension_semantics = [#tpu.dimension_semantics<parallel>, #tpu.dimension_semantics<arbitrary>], iteration_bounds = array<i64: 1, 1>, scalar_prefetch = 0 : i64, scratch_operands = 3 : i64, tpu.core_type = #tpu.core_type<tc>, window_params = [{transform_indices = @transform_0, window_bounds = array<i64: 2, 8, 32>}, {transform_indices = @transform_1, window_bounds = array<i64: 2, 8, 32>}, {transform_indices = @transform_2, window_bounds = array<i64: 2, 8, 32>}, {transform_indices = @transform_3, window_bounds = array<i64: 2, 1, 8>}, {transform_indices = @transform_4, window_bounds = array<i64: 4, 8, 8>}, {transform_indices = @transform_5, window_bounds = array<i64: 2, 8, 32>}]} {
    %c0_i32 = arith.constant 0 : i32
    %0 = arith.cmpi eq, %arg1, %c0_i32 : i32
    %1 = arith.extui %0 : i1 to i32
    %c0_i32_0 = arith.constant 0 : i32
    %2 = arith.cmpi ne, %1, %c0_i32_0 : i32
    scf.if %2 {
      %cst_134 = arith.constant -1.000000e+30 : f32
      %161 = vector.broadcast %cst_134 : f32 to vector<4x2x8x1xf32>
      %c0_135 = arith.constant 0 : index
      %c0_136 = arith.constant 0 : index
      %c0_137 = arith.constant 0 : index
      %c0_138 = arith.constant 0 : index
      %162 = vector.load %arg8[%c0_135, %c0_136, %c0_137, %c0_138] : memref<4x2x8x1xf32, #tpu.memory_space<vmem>>, vector<4x2x8x1xf32>
      tpu.vector_store %arg8[%c0_135, %c0_136, %c0_137, %c0_138], %161 {strides = array<i32>} : memref<4x2x8x1xf32, #tpu.memory_space<vmem>>, vector<4x2x8x1xf32>,
      %cst_139 = arith.constant 0.000000e+00 : f32
      %163 = vector.broadcast %cst_139 : f32 to vector<4x2x8x1xf32>
      %c0_140 = arith.constant 0 : index
      %c0_141 = arith.constant 0 : index
      %c0_142 = arith.constant 0 : index
      %c0_143 = arith.constant 0 : index
      %164 = vector.load %arg9[%c0_140, %c0_141, %c0_142, %c0_143] : memref<4x2x8x1xf32, #tpu.memory_space<vmem>>, vector<4x2x8x1xf32>
      tpu.vector_store %arg9[%c0_140, %c0_141, %c0_142, %c0_143], %163 {strides = array<i32>} : memref<4x2x8x1xf32, #tpu.memory_space<vmem>>, vector<4x2x8x1xf32>,
      %cst_144 = arith.constant 0.000000e+00 : f32
      %165 = vector.broadcast %cst_144 : f32 to vector<2x8x32xf32>
      %c0_145 = arith.constant 0 : index
      %c0_146 = arith.constant 0 : index
      %c0_147 = arith.constant 0 : index
      %166 = vector.load %arg10[%c0_145, %c0_146, %c0_147] : memref<2x8x32xf32, #tpu.memory_space<vmem>>, vector<2x8x32xf32>
      tpu.vector_store %arg10[%c0_145, %c0_146, %c0_147], %165 {strides = array<i32>} : memref<2x8x32xf32, #tpu.memory_space<vmem>>, vector<2x8x32xf32>,
    } else {
    }
    %c0 = arith.constant 0 : index
    %c0_1 = arith.constant 0 : index
    %c0_2 = arith.constant 0 : index
    %3 = vector.load %arg5[%c0, %c0_1, %c0_2] : memref<2x1x8xf32, #tpu.memory_space<vmem>>, vector<2x1x8xf32>
    %cst = arith.constant 1.000000e+00 : f32
    %4 = vector.broadcast %cst : f32 to vector<2x1x8xf32>
    %5 = arith.subf %3, %4 : vector<2x1x8xf32>
    %cst_3 = arith.constant 1.000000e+04 : f32
    %6 = vector.broadcast %cst_3 : f32 to vector<2x1x8xf32>
    %7 = arith.mulf %5, %6 : vector<2x1x8xf32>
    %c0_4 = arith.constant 0 : index
    %c0_5 = arith.constant 0 : index
    %c0_6 = arith.constant 0 : index
    %8 = vector.load %arg2[%c0_4, %c0_5, %c0_6] : memref<2x8x32xf32, #tpu.memory_space<vmem>>, vector<2x8x8xf32>
    %c0_7 = arith.constant 0 : index
    %c0_8 = arith.constant 0 : index
    %c0_9 = arith.constant 0 : index
    %9 = vector.load %arg3[%c0_7, %c0_8, %c0_9] : memref<2x8x32xf32, #tpu.memory_space<vmem>>, vector<2x8x8xf32>
    %c0_10 = arith.constant 0 : index
    %c0_11 = arith.constant 0 : index
    %c0_12 = arith.constant 0 : index
    %10 = vector.load %arg4[%c0_10, %c0_11, %c0_12] : memref<2x8x32xf32, #tpu.memory_space<vmem>>, vector<2x8x8xf32>
    %c0_13 = arith.constant 0 : index
    %c0_14 = arith.constant 0 : index
    %c0_15 = arith.constant 0 : index
    %11 = vector.load %arg6[%c0_13, %c0_14, %c0_15] : memref<4x8x8xf32, #tpu.memory_space<vmem>>, vector<1x8x8xf32>
    %12 = vector.shape_cast %11 : vector<1x8x8xf32> to vector<8x8xf32>
    %cst_16 = arith.constant dense<0.000000e+00> : vector<2x8x8xf32>
    %13 = tpu.matmul %8, %9, %cst_16 {dimension_numbers = #tpu.dot_dimension_numbers<[2], [2], [1], [1], [0, 0, 0, 1, 1, 1], [0], [0]>} : vector<2x8x8xf32>, vector<2x8x8xf32>, vector<2x8x8xf32> -> vector<2x8x8xf32>
    %14 = vector.shape_cast %12 : vector<8x8xf32> to vector<1x8x8xf32>
    %15 = vector.broadcast %14 : vector<1x8x8xf32> to vector<2x8x8xf32>
    %16 = arith.addf %13, %15 : vector<2x8x8xf32>
    %17 = vector.broadcast %7 : vector<2x1x8xf32> to vector<2x8x8xf32>
    %18 = arith.addf %16, %17 : vector<2x8x8xf32>
    %c0_17 = arith.constant 0 : index
    %c0_18 = arith.constant 0 : index
    %c0_19 = arith.constant 0 : index
    %c0_20 = arith.constant 0 : index
    %19 = vector.load %arg8[%c0_17, %c0_18, %c0_19, %c0_20] : memref<4x2x8x1xf32, #tpu.memory_space<vmem>>, vector<1x2x8x1xf32>
    %20 = vector.shape_cast %19 : vector<1x2x8x1xf32> to vector<2x8x1xf32>
    %cst_21 = arith.constant dense<0xFF800000> : vector<2x8xf32>
    %21 = vector.multi_reduction <maximumf>, %18, %cst_21 [2] : vector<2x8x8xf32> to vector<2x8xf32>
    %22 = vector.shape_cast %21 : vector<2x8xf32> to vector<2x8x1xf32>
    %23 = arith.maximumf %20, %22 : vector<2x8x1xf32>
    %24 = arith.subf %20, %23 : vector<2x8x1xf32>
    %25 = math.exp %24 : vector<2x8x1xf32>
    %26 = vector.broadcast %23 : vector<2x8x1xf32> to vector<2x8x8xf32>
    %27 = arith.subf %18, %26 : vector<2x8x8xf32>
    %28 = math.exp %27 : vector<2x8x8xf32>
    %c0_22 = arith.constant 0 : index
    %c0_23 = arith.constant 0 : index
    %c0_24 = arith.constant 0 : index
    %c0_25 = arith.constant 0 : index
    %29 = vector.load %arg9[%c0_22, %c0_23, %c0_24, %c0_25] : memref<4x2x8x1xf32, #tpu.memory_space<vmem>>, vector<1x2x8x1xf32>
    %30 = vector.shape_cast %29 : vector<1x2x8x1xf32> to vector<2x8x1xf32>
    %31 = arith.mulf %25, %30 : vector<2x8x1xf32>
    %cst_26 = arith.constant dense<0.000000e+00> : vector<2x8xf32>
    %32 = vector.multi_reduction <add>, %28, %cst_26 [2] : vector<2x8x8xf32> to vector<2x8xf32>
    %33 = vector.shape_cast %32 : vector<2x8xf32> to vector<2x8x1xf32>
    %34 = arith.addf %31, %33 : vector<2x8x1xf32>
    %c0_27 = arith.constant 0 : index
    %c0_28 = arith.constant 0 : index
    %c0_29 = arith.constant 0 : index
    %c0_30 = arith.constant 0 : index
    %35 = vector.load %arg9[%c0_27, %c0_28, %c0_29, %c0_30] : memref<4x2x8x1xf32, #tpu.memory_space<vmem>>, vector<1x2x8x1xf32>
    %36 = vector.shape_cast %35 : vector<1x2x8x1xf32> to vector<2x8x1xf32>
    %37 = vector.shape_cast %34 : vector<2x8x1xf32> to vector<1x2x8x1xf32>
    tpu.vector_store %arg9[%c0_27, %c0_28, %c0_29, %c0_30], %37 {strides = array<i32>} : memref<4x2x8x1xf32, #tpu.memory_space<vmem>>, vector<1x2x8x1xf32>,
    %c0_31 = arith.constant 0 : index
    %c0_32 = arith.constant 0 : index
    %c0_33 = arith.constant 0 : index
    %c0_34 = arith.constant 0 : index
    %38 = vector.load %arg8[%c0_31, %c0_32, %c0_33, %c0_34] : memref<4x2x8x1xf32, #tpu.memory_space<vmem>>, vector<1x2x8x1xf32>
    %39 = vector.shape_cast %38 : vector<1x2x8x1xf32> to vector<2x8x1xf32>
    %40 = vector.shape_cast %23 : vector<2x8x1xf32> to vector<1x2x8x1xf32>
    tpu.vector_store %arg8[%c0_31, %c0_32, %c0_33, %c0_34], %40 {strides = array<i32>} : memref<4x2x8x1xf32, #tpu.memory_space<vmem>>, vector<1x2x8x1xf32>,
    %cst_35 = arith.constant dense<0.000000e+00> : vector<2x8x8xf32>
    %41 = tpu.matmul %28, %10, %cst_35 {dimension_numbers = #tpu.dot_dimension_numbers<[2], [1], [1], [2], [0, 0, 0, 1, 1, 2], [0], [0]>} : vector<2x8x8xf32>, vector<2x8x8xf32>, vector<2x8x8xf32> -> vector<2x8x8xf32>
    %42 = vector.shape_cast %25 : vector<2x8x1xf32> to vector<2x8x1xf32>
    %43 = vector.broadcast %42 : vector<2x8x1xf32> to vector<2x8x8xf32>
    %c0_36 = arith.constant 0 : index
    %c0_37 = arith.constant 0 : index
    %c8 = arith.constant 8 : index
    %44 = vector.load %arg2[%c0_36, %c0_37, %c8] : memref<2x8x32xf32, #tpu.memory_space<vmem>>, vector<2x8x8xf32>
    %c0_38 = arith.constant 0 : index
    %c0_39 = arith.constant 0 : index
    %c8_40 = arith.constant 8 : index
    %45 = vector.load %arg3[%c0_38, %c0_39, %c8_40] : memref<2x8x32xf32, #tpu.memory_space<vmem>>, vector<2x8x8xf32>
    %c0_41 = arith.constant 0 : index
    %c0_42 = arith.constant 0 : index
    %c8_43 = arith.constant 8 : index
    %46 = vector.load %arg4[%c0_41, %c0_42, %c8_43] : memref<2x8x32xf32, #tpu.memory_space<vmem>>, vector<2x8x8xf32>
    %c1 = arith.constant 1 : index
    %c0_44 = arith.constant 0 : index
    %c0_45 = arith.constant 0 : index
    %47 = vector.load %arg6[%c1, %c0_44, %c0_45] : memref<4x8x8xf32, #tpu.memory_space<vmem>>, vector<1x8x8xf32>
    %48 = vector.shape_cast %47 : vector<1x8x8xf32> to vector<8x8xf32>
    %cst_46 = arith.constant dense<0.000000e+00> : vector<2x8x8xf32>
    %49 = tpu.matmul %44, %45, %cst_46 {dimension_numbers = #tpu.dot_dimension_numbers<[2], [2], [1], [1], [0, 0, 0, 1, 1, 1], [0], [0]>} : vector<2x8x8xf32>, vector<2x8x8xf32>, vector<2x8x8xf32> -> vector<2x8x8xf32>
    %50 = vector.shape_cast %48 : vector<8x8xf32> to vector<1x8x8xf32>
    %51 = vector.broadcast %50 : vector<1x8x8xf32> to vector<2x8x8xf32>
    %52 = arith.addf %49, %51 : vector<2x8x8xf32>
    %53 = vector.broadcast %7 : vector<2x1x8xf32> to vector<2x8x8xf32>
    %54 = arith.addf %52, %53 : vector<2x8x8xf32>
    %c1_47 = arith.constant 1 : index
    %c0_48 = arith.constant 0 : index
    %c0_49 = arith.constant 0 : index
    %c0_50 = arith.constant 0 : index
    %55 = vector.load %arg8[%c1_47, %c0_48, %c0_49, %c0_50] : memref<4x2x8x1xf32, #tpu.memory_space<vmem>>, vector<1x2x8x1xf32>
    %56 = vector.shape_cast %55 : vector<1x2x8x1xf32> to vector<2x8x1xf32>
    %cst_51 = arith.constant dense<0xFF800000> : vector<2x8xf32>
    %57 = vector.multi_reduction <maximumf>, %54, %cst_51 [2] : vector<2x8x8xf32> to vector<2x8xf32>
    %58 = vector.shape_cast %57 : vector<2x8xf32> to vector<2x8x1xf32>
    %59 = arith.maximumf %56, %58 : vector<2x8x1xf32>
    %60 = arith.subf %56, %59 : vector<2x8x1xf32>
    %61 = math.exp %60 : vector<2x8x1xf32>
    %62 = vector.broadcast %59 : vector<2x8x1xf32> to vector<2x8x8xf32>
    %63 = arith.subf %54, %62 : vector<2x8x8xf32>
    %64 = math.exp %63 : vector<2x8x8xf32>
    %c1_52 = arith.constant 1 : index
    %c0_53 = arith.constant 0 : index
    %c0_54 = arith.constant 0 : index
    %c0_55 = arith.constant 0 : index
    %65 = vector.load %arg9[%c1_52, %c0_53, %c0_54, %c0_55] : memref<4x2x8x1xf32, #tpu.memory_space<vmem>>, vector<1x2x8x1xf32>
    %66 = vector.shape_cast %65 : vector<1x2x8x1xf32> to vector<2x8x1xf32>
    %67 = arith.mulf %61, %66 : vector<2x8x1xf32>
    %cst_56 = arith.constant dense<0.000000e+00> : vector<2x8xf32>
    %68 = vector.multi_reduction <add>, %64, %cst_56 [2] : vector<2x8x8xf32> to vector<2x8xf32>
    %69 = vector.shape_cast %68 : vector<2x8xf32> to vector<2x8x1xf32>
    %70 = arith.addf %67, %69 : vector<2x8x1xf32>
    %c1_57 = arith.constant 1 : index
    %c0_58 = arith.constant 0 : index
    %c0_59 = arith.constant 0 : index
    %c0_60 = arith.constant 0 : index
    %71 = vector.load %arg9[%c1_57, %c0_58, %c0_59, %c0_60] : memref<4x2x8x1xf32, #tpu.memory_space<vmem>>, vector<1x2x8x1xf32>
    %72 = vector.shape_cast %71 : vector<1x2x8x1xf32> to vector<2x8x1xf32>
    %73 = vector.shape_cast %70 : vector<2x8x1xf32> to vector<1x2x8x1xf32>
    tpu.vector_store %arg9[%c1_57, %c0_58, %c0_59, %c0_60], %73 {strides = array<i32>} : memref<4x2x8x1xf32, #tpu.memory_space<vmem>>, vector<1x2x8x1xf32>,
    %c1_61 = arith.constant 1 : index
    %c0_62 = arith.constant 0 : index
    %c0_63 = arith.constant 0 : index
    %c0_64 = arith.constant 0 : index
    %74 = vector.load %arg8[%c1_61, %c0_62, %c0_63, %c0_64] : memref<4x2x8x1xf32, #tpu.memory_space<vmem>>, vector<1x2x8x1xf32>
    %75 = vector.shape_cast %74 : vector<1x2x8x1xf32> to vector<2x8x1xf32>
    %76 = vector.shape_cast %59 : vector<2x8x1xf32> to vector<1x2x8x1xf32>
    tpu.vector_store %arg8[%c1_61, %c0_62, %c0_63, %c0_64], %76 {strides = array<i32>} : memref<4x2x8x1xf32, #tpu.memory_space<vmem>>, vector<1x2x8x1xf32>,
    %cst_65 = arith.constant dense<0.000000e+00> : vector<2x8x8xf32>
    %77 = tpu.matmul %64, %46, %cst_65 {dimension_numbers = #tpu.dot_dimension_numbers<[2], [1], [1], [2], [0, 0, 0, 1, 1, 2], [0], [0]>} : vector<2x8x8xf32>, vector<2x8x8xf32>, vector<2x8x8xf32> -> vector<2x8x8xf32>
    %78 = vector.shape_cast %61 : vector<2x8x1xf32> to vector<2x8x1xf32>
    %79 = vector.broadcast %78 : vector<2x8x1xf32> to vector<2x8x8xf32>
    %c0_66 = arith.constant 0 : index
    %c0_67 = arith.constant 0 : index
    %c16 = arith.constant 16 : index
    %80 = vector.load %arg2[%c0_66, %c0_67, %c16] : memref<2x8x32xf32, #tpu.memory_space<vmem>>, vector<2x8x8xf32>
    %c0_68 = arith.constant 0 : index
    %c0_69 = arith.constant 0 : index
    %c16_70 = arith.constant 16 : index
    %81 = vector.load %arg3[%c0_68, %c0_69, %c16_70] : memref<2x8x32xf32, #tpu.memory_space<vmem>>, vector<2x8x8xf32>
    %c0_71 = arith.constant 0 : index
    %c0_72 = arith.constant 0 : index
    %c16_73 = arith.constant 16 : index
    %82 = vector.load %arg4[%c0_71, %c0_72, %c16_73] : memref<2x8x32xf32, #tpu.memory_space<vmem>>, vector<2x8x8xf32>
    %c2 = arith.constant 2 : index
    %c0_74 = arith.constant 0 : index
    %c0_75 = arith.constant 0 : index
    %83 = vector.load %arg6[%c2, %c0_74, %c0_75] : memref<4x8x8xf32, #tpu.memory_space<vmem>>, vector<1x8x8xf32>
    %84 = vector.shape_cast %83 : vector<1x8x8xf32> to vector<8x8xf32>
    %cst_76 = arith.constant dense<0.000000e+00> : vector<2x8x8xf32>
    %85 = tpu.matmul %80, %81, %cst_76 {dimension_numbers = #tpu.dot_dimension_numbers<[2], [2], [1], [1], [0, 0, 0, 1, 1, 1], [0], [0]>} : vector<2x8x8xf32>, vector<2x8x8xf32>, vector<2x8x8xf32> -> vector<2x8x8xf32>
    %86 = vector.shape_cast %84 : vector<8x8xf32> to vector<1x8x8xf32>
    %87 = vector.broadcast %86 : vector<1x8x8xf32> to vector<2x8x8xf32>
    %88 = arith.addf %85, %87 : vector<2x8x8xf32>
    %89 = vector.broadcast %7 : vector<2x1x8xf32> to vector<2x8x8xf32>
    %90 = arith.addf %88, %89 : vector<2x8x8xf32>
    %c2_77 = arith.constant 2 : index
    %c0_78 = arith.constant 0 : index
    %c0_79 = arith.constant 0 : index
    %c0_80 = arith.constant 0 : index
    %91 = vector.load %arg8[%c2_77, %c0_78, %c0_79, %c0_80] : memref<4x2x8x1xf32, #tpu.memory_space<vmem>>, vector<1x2x8x1xf32>
    %92 = vector.shape_cast %91 : vector<1x2x8x1xf32> to vector<2x8x1xf32>
    %cst_81 = arith.constant dense<0xFF800000> : vector<2x8xf32>
    %93 = vector.multi_reduction <maximumf>, %90, %cst_81 [2] : vector<2x8x8xf32> to vector<2x8xf32>
    %94 = vector.shape_cast %93 : vector<2x8xf32> to vector<2x8x1xf32>
    %95 = arith.maximumf %92, %94 : vector<2x8x1xf32>
    %96 = arith.subf %92, %95 : vector<2x8x1xf32>
    %97 = math.exp %96 : vector<2x8x1xf32>
    %98 = vector.broadcast %95 : vector<2x8x1xf32> to vector<2x8x8xf32>
    %99 = arith.subf %90, %98 : vector<2x8x8xf32>
    %100 = math.exp %99 : vector<2x8x8xf32>
    %c2_82 = arith.constant 2 : index
    %c0_83 = arith.constant 0 : index
    %c0_84 = arith.constant 0 : index
    %c0_85 = arith.constant 0 : index
    %101 = vector.load %arg9[%c2_82, %c0_83, %c0_84, %c0_85] : memref<4x2x8x1xf32, #tpu.memory_space<vmem>>, vector<1x2x8x1xf32>
    %102 = vector.shape_cast %101 : vector<1x2x8x1xf32> to vector<2x8x1xf32>
    %103 = arith.mulf %97, %102 : vector<2x8x1xf32>
    %cst_86 = arith.constant dense<0.000000e+00> : vector<2x8xf32>
    %104 = vector.multi_reduction <add>, %100, %cst_86 [2] : vector<2x8x8xf32> to vector<2x8xf32>
    %105 = vector.shape_cast %104 : vector<2x8xf32> to vector<2x8x1xf32>
    %106 = arith.addf %103, %105 : vector<2x8x1xf32>
    %c2_87 = arith.constant 2 : index
    %c0_88 = arith.constant 0 : index
    %c0_89 = arith.constant 0 : index
    %c0_90 = arith.constant 0 : index
    %107 = vector.load %arg9[%c2_87, %c0_88, %c0_89, %c0_90] : memref<4x2x8x1xf32, #tpu.memory_space<vmem>>, vector<1x2x8x1xf32>
    %108 = vector.shape_cast %107 : vector<1x2x8x1xf32> to vector<2x8x1xf32>
    %109 = vector.shape_cast %106 : vector<2x8x1xf32> to vector<1x2x8x1xf32>
    tpu.vector_store %arg9[%c2_87, %c0_88, %c0_89, %c0_90], %109 {strides = array<i32>} : memref<4x2x8x1xf32, #tpu.memory_space<vmem>>, vector<1x2x8x1xf32>,
    %c2_91 = arith.constant 2 : index
    %c0_92 = arith.constant 0 : index
    %c0_93 = arith.constant 0 : index
    %c0_94 = arith.constant 0 : index
    %110 = vector.load %arg8[%c2_91, %c0_92, %c0_93, %c0_94] : memref<4x2x8x1xf32, #tpu.memory_space<vmem>>, vector<1x2x8x1xf32>
    %111 = vector.shape_cast %110 : vector<1x2x8x1xf32> to vector<2x8x1xf32>
    %112 = vector.shape_cast %95 : vector<2x8x1xf32> to vector<1x2x8x1xf32>
    tpu.vector_store %arg8[%c2_91, %c0_92, %c0_93, %c0_94], %112 {strides = array<i32>} : memref<4x2x8x1xf32, #tpu.memory_space<vmem>>, vector<1x2x8x1xf32>,
    %cst_95 = arith.constant dense<0.000000e+00> : vector<2x8x8xf32>
    %113 = tpu.matmul %100, %82, %cst_95 {dimension_numbers = #tpu.dot_dimension_numbers<[2], [1], [1], [2], [0, 0, 0, 1, 1, 2], [0], [0]>} : vector<2x8x8xf32>, vector<2x8x8xf32>, vector<2x8x8xf32> -> vector<2x8x8xf32>
    %114 = vector.shape_cast %97 : vector<2x8x1xf32> to vector<2x8x1xf32>
    %115 = vector.broadcast %114 : vector<2x8x1xf32> to vector<2x8x8xf32>
    %c0_96 = arith.constant 0 : index
    %c0_97 = arith.constant 0 : index
    %c24 = arith.constant 24 : index
    %116 = vector.load %arg2[%c0_96, %c0_97, %c24] : memref<2x8x32xf32, #tpu.memory_space<vmem>>, vector<2x8x8xf32>
    %c0_98 = arith.constant 0 : index
    %c0_99 = arith.constant 0 : index
    %c24_100 = arith.constant 24 : index
    %117 = vector.load %arg3[%c0_98, %c0_99, %c24_100] : memref<2x8x32xf32, #tpu.memory_space<vmem>>, vector<2x8x8xf32>
    %c0_101 = arith.constant 0 : index
    %c0_102 = arith.constant 0 : index
    %c24_103 = arith.constant 24 : index
    %118 = vector.load %arg4[%c0_101, %c0_102, %c24_103] : memref<2x8x32xf32, #tpu.memory_space<vmem>>, vector<2x8x8xf32>
    %c3 = arith.constant 3 : index
    %c0_104 = arith.constant 0 : index
    %c0_105 = arith.constant 0 : index
    %119 = vector.load %arg6[%c3, %c0_104, %c0_105] : memref<4x8x8xf32, #tpu.memory_space<vmem>>, vector<1x8x8xf32>
    %120 = vector.shape_cast %119 : vector<1x8x8xf32> to vector<8x8xf32>
    %cst_106 = arith.constant dense<0.000000e+00> : vector<2x8x8xf32>
    %121 = tpu.matmul %116, %117, %cst_106 {dimension_numbers = #tpu.dot_dimension_numbers<[2], [2], [1], [1], [0, 0, 0, 1, 1, 1], [0], [0]>} : vector<2x8x8xf32>, vector<2x8x8xf32>, vector<2x8x8xf32> -> vector<2x8x8xf32>
    %122 = vector.shape_cast %120 : vector<8x8xf32> to vector<1x8x8xf32>
    %123 = vector.broadcast %122 : vector<1x8x8xf32> to vector<2x8x8xf32>
    %124 = arith.addf %121, %123 : vector<2x8x8xf32>
    %125 = vector.broadcast %7 : vector<2x1x8xf32> to vector<2x8x8xf32>
    %126 = arith.addf %124, %125 : vector<2x8x8xf32>
    %c3_107 = arith.constant 3 : index
    %c0_108 = arith.constant 0 : index
    %c0_109 = arith.constant 0 : index
    %c0_110 = arith.constant 0 : index
    %127 = vector.load %arg8[%c3_107, %c0_108, %c0_109, %c0_110] : memref<4x2x8x1xf32, #tpu.memory_space<vmem>>, vector<1x2x8x1xf32>
    %128 = vector.shape_cast %127 : vector<1x2x8x1xf32> to vector<2x8x1xf32>
    %cst_111 = arith.constant dense<0xFF800000> : vector<2x8xf32>
    %129 = vector.multi_reduction <maximumf>, %126, %cst_111 [2] : vector<2x8x8xf32> to vector<2x8xf32>
    %130 = vector.shape_cast %129 : vector<2x8xf32> to vector<2x8x1xf32>
    %131 = arith.maximumf %128, %130 : vector<2x8x1xf32>
    %132 = arith.subf %128, %131 : vector<2x8x1xf32>
    %133 = math.exp %132 : vector<2x8x1xf32>
    %134 = vector.broadcast %131 : vector<2x8x1xf32> to vector<2x8x8xf32>
    %135 = arith.subf %126, %134 : vector<2x8x8xf32>
    %136 = math.exp %135 : vector<2x8x8xf32>
    %c3_112 = arith.constant 3 : index
    %c0_113 = arith.constant 0 : index
    %c0_114 = arith.constant 0 : index
    %c0_115 = arith.constant 0 : index
    %137 = vector.load %arg9[%c3_112, %c0_113, %c0_114, %c0_115] : memref<4x2x8x1xf32, #tpu.memory_space<vmem>>, vector<1x2x8x1xf32>
    %138 = vector.shape_cast %137 : vector<1x2x8x1xf32> to vector<2x8x1xf32>
    %139 = arith.mulf %133, %138 : vector<2x8x1xf32>
    %cst_116 = arith.constant dense<0.000000e+00> : vector<2x8xf32>
    %140 = vector.multi_reduction <add>, %136, %cst_116 [2] : vector<2x8x8xf32> to vector<2x8xf32>
    %141 = vector.shape_cast %140 : vector<2x8xf32> to vector<2x8x1xf32>
    %142 = arith.addf %139, %141 : vector<2x8x1xf32>
    %c3_117 = arith.constant 3 : index
    %c0_118 = arith.constant 0 : index
    %c0_119 = arith.constant 0 : index
    %c0_120 = arith.constant 0 : index
    %143 = vector.load %arg9[%c3_117, %c0_118, %c0_119, %c0_120] : memref<4x2x8x1xf32, #tpu.memory_space<vmem>>, vector<1x2x8x1xf32>
    %144 = vector.shape_cast %143 : vector<1x2x8x1xf32> to vector<2x8x1xf32>
    %145 = vector.shape_cast %142 : vector<2x8x1xf32> to vector<1x2x8x1xf32>
    tpu.vector_store %arg9[%c3_117, %c0_118, %c0_119, %c0_120], %145 {strides = array<i32>} : memref<4x2x8x1xf32, #tpu.memory_space<vmem>>, vector<1x2x8x1xf32>,
    %c3_121 = arith.constant 3 : index
    %c0_122 = arith.constant 0 : index
    %c0_123 = arith.constant 0 : index
    %c0_124 = arith.constant 0 : index
    %146 = vector.load %arg8[%c3_121, %c0_122, %c0_123, %c0_124] : memref<4x2x8x1xf32, #tpu.memory_space<vmem>>, vector<1x2x8x1xf32>
    %147 = vector.shape_cast %146 : vector<1x2x8x1xf32> to vector<2x8x1xf32>
    %148 = vector.shape_cast %131 : vector<2x8x1xf32> to vector<1x2x8x1xf32>
    tpu.vector_store %arg8[%c3_121, %c0_122, %c0_123, %c0_124], %148 {strides = array<i32>} : memref<4x2x8x1xf32, #tpu.memory_space<vmem>>, vector<1x2x8x1xf32>,
    %cst_125 = arith.constant dense<0.000000e+00> : vector<2x8x8xf32>
    %149 = tpu.matmul %136, %118, %cst_125 {dimension_numbers = #tpu.dot_dimension_numbers<[2], [1], [1], [2], [0, 0, 0, 1, 1, 2], [0], [0]>} : vector<2x8x8xf32>, vector<2x8x8xf32>, vector<2x8x8xf32> -> vector<2x8x8xf32>
    %150 = vector.shape_cast %133 : vector<2x8x1xf32> to vector<2x8x1xf32>
    %151 = vector.broadcast %150 : vector<2x8x1xf32> to vector<2x8x8xf32>
    %152 = tpu.concatenate %41, %77, %113, %149 in 2 : vector<2x8x8xf32>, vector<2x8x8xf32>, vector<2x8x8xf32>, vector<2x8x8xf32> -> vector<2x8x32xf32>
    %153 = tpu.concatenate %43, %79, %115, %151 in 2 : vector<2x8x8xf32>, vector<2x8x8xf32>, vector<2x8x8xf32>, vector<2x8x8xf32> -> vector<2x8x32xf32>
    %c0_126 = arith.constant 0 : index
    %c0_127 = arith.constant 0 : index
    %c0_128 = arith.constant 0 : index
    %154 = vector.load %arg10[%c0_126, %c0_127, %c0_128] : memref<2x8x32xf32, #tpu.memory_space<vmem>>, vector<2x8x32xf32>
    %155 = arith.mulf %153, %154 : vector<2x8x32xf32>
    %156 = arith.addf %155, %152 : vector<2x8x32xf32>
    %c0_129 = arith.constant 0 : index
    %c0_130 = arith.constant 0 : index
    %c0_131 = arith.constant 0 : index
    %157 = vector.load %arg10[%c0_129, %c0_130, %c0_131] : memref<2x8x32xf32, #tpu.memory_space<vmem>>, vector<2x8x32xf32>
    tpu.vector_store %arg10[%c0_129, %c0_130, %c0_131], %156 {strides = array<i32>} : memref<2x8x32xf32, #tpu.memory_space<vmem>>, vector<2x8x32xf32>,
    %c0_i32_132 = arith.constant 0 : i32
    %158 = arith.cmpi eq, %arg1, %c0_i32_132 : i32
    %159 = arith.extui %158 : i1 to i32
    %c0_i32_133 = arith.constant 0 : i32
    %160 = arith.cmpi ne, %159, %c0_i32_133 : i32
    scf.if %160 {
      %c0_134 = arith.constant 0 : index
      %c0_135 = arith.constant 0 : index
      %c0_136 = arith.constant 0 : index
      %c0_137 = arith.constant 0 : index
      %161 = vector.load %arg9[%c0_134, %c0_135, %c0_136, %c0_137] : memref<4x2x8x1xf32, #tpu.memory_space<vmem>>, vector<1x2x8x1xf32>
      %162 = vector.shape_cast %161 : vector<1x2x8x1xf32> to vector<2x8x1xf32>
      %163 = tpu.reciprocal %162 {approx = true} : vector<2x8x1xf32> -> vector<2x8x1xf32>
      %164 = vector.shape_cast %163 : vector<2x8x1xf32> to vector<2x8x1xf32>
      %165 = vector.broadcast %164 : vector<2x8x1xf32> to vector<2x8x8xf32>
      %c1_138 = arith.constant 1 : index
      %c0_139 = arith.constant 0 : index
      %c0_140 = arith.constant 0 : index
      %c0_141 = arith.constant 0 : index
      %166 = vector.load %arg9[%c1_138, %c0_139, %c0_140, %c0_141] : memref<4x2x8x1xf32, #tpu.memory_space<vmem>>, vector<1x2x8x1xf32>
      %167 = vector.shape_cast %166 : vector<1x2x8x1xf32> to vector<2x8x1xf32>
      %168 = tpu.reciprocal %167 {approx = true} : vector<2x8x1xf32> -> vector<2x8x1xf32>
      %169 = vector.shape_cast %168 : vector<2x8x1xf32> to vector<2x8x1xf32>
      %170 = vector.broadcast %169 : vector<2x8x1xf32> to vector<2x8x8xf32>
      %c2_142 = arith.constant 2 : index
      %c0_143 = arith.constant 0 : index
      %c0_144 = arith.constant 0 : index
      %c0_145 = arith.constant 0 : index
      %171 = vector.load %arg9[%c2_142, %c0_143, %c0_144, %c0_145] : memref<4x2x8x1xf32, #tpu.memory_space<vmem>>, vector<1x2x8x1xf32>
      %172 = vector.shape_cast %171 : vector<1x2x8x1xf32> to vector<2x8x1xf32>
      %173 = tpu.reciprocal %172 {approx = true} : vector<2x8x1xf32> -> vector<2x8x1xf32>
      %174 = vector.shape_cast %173 : vector<2x8x1xf32> to vector<2x8x1xf32>
      %175 = vector.broadcast %174 : vector<2x8x1xf32> to vector<2x8x8xf32>
      %c3_146 = arith.constant 3 : index
      %c0_147 = arith.constant 0 : index
      %c0_148 = arith.constant 0 : index
      %c0_149 = arith.constant 0 : index
      %176 = vector.load %arg9[%c3_146, %c0_147, %c0_148, %c0_149] : memref<4x2x8x1xf32, #tpu.memory_space<vmem>>, vector<1x2x8x1xf32>
      %177 = vector.shape_cast %176 : vector<1x2x8x1xf32> to vector<2x8x1xf32>
      %178 = tpu.reciprocal %177 {approx = true} : vector<2x8x1xf32> -> vector<2x8x1xf32>
      %179 = vector.shape_cast %178 : vector<2x8x1xf32> to vector<2x8x1xf32>
      %180 = vector.broadcast %179 : vector<2x8x1xf32> to vector<2x8x8xf32>
      %181 = tpu.concatenate %165, %170, %175, %180 in 2 : vector<2x8x8xf32>, vector<2x8x8xf32>, vector<2x8x8xf32>, vector<2x8x8xf32> -> vector<2x8x32xf32>
      %c0_150 = arith.constant 0 : index
      %c0_151 = arith.constant 0 : index
      %c0_152 = arith.constant 0 : index
      %182 = vector.load %arg10[%c0_150, %c0_151, %c0_152] : memref<2x8x32xf32, #tpu.memory_space<vmem>>, vector<2x8x32xf32>
      %183 = arith.mulf %182, %181 : vector<2x8x32xf32>
      %c0_153 = arith.constant 0 : index
      %c0_154 = arith.constant 0 : index
      %c0_155 = arith.constant 0 : index
      %184 = vector.load %arg7[%c0_153, %c0_154, %c0_155] : memref<2x8x32xf32, #tpu.memory_space<vmem>>, vector<2x8x32xf32>
      tpu.vector_store %arg7[%c0_153, %c0_154, %c0_155], %183 {strides = array<i32>} : memref<2x8x32xf32, #tpu.memory_space<vmem>>, vector<2x8x32xf32>,
    } else {
    }
    return
  }
  func.func @transform_0(%arg0: i32, %arg1: i32) -> (i32, i32, i32) {
    %c0_i32 = arith.constant 0 : i32
    %c0_i32_0 = arith.constant 0 : i32
    %c0_i32_1 = arith.constant 0 : i32
    return %c0_i32, %arg0, %c0_i32_0 : i32, i32, i32
  }
  func.func @transform_1(%arg0: i32, %arg1: i32) -> (i32, i32, i32) {
    %c0_i32 = arith.constant 0 : i32
    %c0_i32_0 = arith.constant 0 : i32
    %c0_i32_1 = arith.constant 0 : i32
    return %c0_i32, %arg1, %c0_i32_0 : i32, i32, i32
  }
  func.func @transform_2(%arg0: i32, %arg1: i32) -> (i32, i32, i32) {
    %c0_i32 = arith.constant 0 : i32
    %c0_i32_0 = arith.constant 0 : i32
    %c0_i32_1 = arith.constant 0 : i32
    return %c0_i32, %arg1, %c0_i32_0 : i32, i32, i32
  }
  func.func @transform_3(%arg0: i32, %arg1: i32) -> (i32, i32, i32) {
    %c0_i32 = arith.constant 0 : i32
    %c0_i32_0 = arith.constant 0 : i32
    %c0_i32_1 = arith.constant 0 : i32
    return %c0_i32, %c0_i32_0, %arg1 : i32, i32, i32
  }
  func.func @transform_4(%arg0: i32, %arg1: i32) -> (i32, i32, i32) {
    %c0_i32 = arith.constant 0 : i32
    %c0_i32_0 = arith.constant 0 : i32
    return %c0_i32, %arg0, %arg1 : i32, i32, i32
  }
  func.func @transform_5(%arg0: i32, %arg1: i32) -> (i32, i32, i32) {
    %c0_i32 = arith.constant 0 : i32
    %c0_i32_0 = arith.constant 0 : i32
    %c0_i32_1 = arith.constant 0 : i32
    return %c0_i32, %arg0, %c0_i32_0 : i32, i32, i32
  }
}

</mosaic_0001>

<bundles_post_ra>
// kernel: parallel_attention_forward.5
= control target key start
LH: loop header
LB: loop body
LE: loop exit
PB: predicated region body
PF: predicated region fallthrough
CT: control target
= control target key end

     0   :  { %vm16_vm0 = vcmask 261120   ;;  %v181_v3 = vmov 0.0   ;;  %s229_s0 = inlined_call_operand.vmem [shape: f32[16,32], index: 0, kind: input, shape index: {}]   ;;  %s230_s1 = inlined_call_operand.vmem [shape: f32[32,32], index: 1, kind: input, shape index: {}]   ;;  %s231_s2 = inlined_call_operand.hbm [shape: f32[16,32], index: 2, kind: output, shape index: {}]  }
   0x1   :  { %v26_v0 = vld [vmem:[%s230_s1 + $0x18] sm:$0xff]  ;;  %v25_v1 = vld [vmem:[%s230_s1 + $0x10] sm:$0xff]  ;;  %v19_v2 = vld [vmem:[%s229_s0] sm:$0xff]  ;;  %18 = vst.msk [vmem:[#allocation2 + $0x8] sm:$0xff] %vm16_vm0, %v181_v3 }
   0x2   :  { %144 = vmatprep.subr.mxu0 %v26_v0  ;;  %17 = vst.msk [vmem:[#allocation2] sm:$0xff] %vm16_vm0, %v181_v3  ;;  %v24_v4 = vld [vmem:[%s230_s1 + $0x8] sm:$0xff]  ;;  %152 = vmatprep.mubr.msk.f32.mxu0 %vm16_vm0, %v19_v2 }
   0x3   :  { %145 = vmatpush3.msra.mxu0 %v26_v0 }
   0x4   :  { %7 = vsyncpa [#allocation4], 0  ;;  %146 = vmatprep.subr.mxu0 %v25_v1  ;;  %v23_v5 = vld [vmem:[%s230_s1] sm:$0xff]  ;;  %v20_v6 = vld [vmem:[%s229_s0 + $0x8] sm:$0xff]  ;;  %s182_s1 = smov [#allocation3]  }
   0x5   :  { %147 = vmatpush3.msra.mxu0 %v25_v1  ;;  %s125_s21 = sshll.u32 %s182_s1, 4  ;;  %s126_s21 = int_to_ptr.vmem [resolvable:$true] %s125_s21 }
   0x6   :  { %148 = vmatprep.subr.mxu0 %v24_v4  ;;  %s159_s0 = scalar_lea.vmem %s126_s21, 256  ;;  %p164_p1 = scmp.lt.s32.totalorder %s126_s21, %s126_s21 }
   0x7   :  { %149 = vmatpush3.msra.mxu0 %v24_v4  ;;  %p160_p0 = scmp.ne.s32.totalorder %s126_s21, %s159_s0  ;;  %p165_p2 = scmp.lt.s32.totalorder %s159_s0, %s159_s0 }
   0x8   :  { %150 = vmatprep.subr.mxu0 %v23_v5  ;;  %v22_v7 = vld [vmem:[#allocation2 + $0x8] sm:$0xff] }
   0x9   :  { %151 = vmatpush3.msra.mxu0 %v23_v5  ;;  %v21_v9 = vld [vmem:[#allocation2] sm:$0xff]  ;;  %p166_p3 = por %p165_p2, %p164_p1 }
   0xa   :  { %153 = vmatmul.mubr.msk.f32.vlgmr.msra.gmra.mxu0 %vm16_vm0, %v20_v6 }
   0xb   :  { %p167_p4 = pnand %p166_p3, %p160_p0 }
  0xca   :  { %v154_v8 = vpop.f32.mrf.mxu0 }
  0xcb   :  { %v110_v10 = vadd.f32 %v154_v8, %v22_v7 }
  0xcc   :  { %v100_v11 = vpop.f32.mrf.mxu0 }
  0xcd   :  { %112 = vst.msk [vmem:[#allocation2 + $0x8] sm:$0xff] %vm16_vm0, %v110_v10  ;;  %v109_v12 = vadd.f32 %v100_v11, %v21_v9 }
  0xcf   :  { %111 = vst.msk [vmem:[#allocation2] sm:$0xff] %vm16_vm0, %v109_v12 }
  0xd4   :  { %v117_v13 = vld [vmem:[#allocation2 + $0x8] sm:$0xff] }
  0xd5   :  { %119 = vst.msk [vmem:[#allocation3 + $0x8] sm:$0xff] %vm16_vm0, %v117_v13 }
  0xd6   :  { %v116_v14 = vld [vmem:[#allocation2] sm:$0xff] }
  0xd7   :  { %118 = vst.msk [vmem:[#allocation3] sm:$0xff] %vm16_vm0, %v116_v14 }
  0xd8   :  { %170 = shalt.err (!%p167_p4)
}
  0xd9   :  { %s183_s22 = smov 128   ;;  %s184_s23 = smov 8  }
  0xda   :  { %131 = dma.vmem_to_hbm [thread:$0]  %s126_s21, 256, %s231_s2, [#allocation4], %s183_s22, %s183_s22, %s184_s23  }
  0xdb   :  { %179 = dma.done.wait [#allocation4], 256  }
  0xdc   :  { %180 = vsyncadd [#allocation4], 4294967040 }
  0xdd   :  { %135 = vsyncpa [#allocation4], 1 }

// kernel: parallel_attention_forward.3
= control target key start
LH: loop header
LB: loop body
LE: loop exit
PB: predicated region body
PF: predicated region fallthrough
CT: control target
= control target key end

     0   :  { %vm24_vm0 = vcmask 261120   ;;  %v380_v2 = vmov 0.0   ;;  %s500_s1 = inlined_call_operand.vmem [shape: f32[32,32], index: 1, kind: input, shape index: {}]   ;;  %s501_s2 = inlined_call_operand.vmem [shape: f32[32,32], index: 2, kind: input, shape index: {}]   ;;  %s502_s0 = inlined_call_operand.vmem [shape: f32[16,32], index: 0, kind: input, shape index: {}]   ;;  %s503_s3 = inlined_call_operand.vmem [shape: f32[32,32], index: 3, kind: input, shape index: {}]   ;;  %s504_s4 = inlined_call_operand.vmem [shape: f32[16,32], index: 4, kind: output, shape index: {0}]   ;;  %s505_s5 = inlined_call_operand.vmem [shape: f32[16,32], index: 5, kind: output, shape index: {1}]   ;;  %s506_s6 = inlined_call_operand.vmem [shape: f32[16,32], index: 6, kind: output, shape index: {2}]  }
   0x1   :  { %v38_v0 = vld [vmem:[%s500_s1 + $0x18] sm:$0xff]  ;;  %v37_v1 = vld [vmem:[%s500_s1 + $0x10] sm:$0xff]  ;;  %26 = vst.msk [vmem:[#allocation2 + $0x8] sm:$0xff] %vm24_vm0, %v380_v2  ;;  %25 = vst.msk [vmem:[#allocation2] sm:$0xff] %vm24_vm0, %v380_v2 }
   0x2   :  { %27 = vst.msk [vmem:[#allocation3] sm:$0xff] %vm24_vm0, %v380_v2  ;;  %28 = vst.msk [vmem:[#allocation3 + $0x8] sm:$0xff] %vm24_vm0, %v380_v2  ;;  %346 = vmatprep.subr.mxu0 %v38_v0  ;;  %v130_v3 = vld [vmem:[%s501_s2 + $0x18] sm:$0xff]  ;;  %v31_v4 = vld [vmem:[%s502_s0] sm:$0xff] }
   0x3   :  { %29 = vst.msk [vmem:[#allocation4] sm:$0xff] %vm24_vm0, %v380_v2  ;;  %30 = vst.msk [vmem:[#allocation4 + $0x8] sm:$0xff] %vm24_vm0, %v380_v2  ;;  %347 = vmatpush3.msra.mxu0 %v38_v0  ;;  %v36_v5 = vld [vmem:[%s500_s1 + $0x8] sm:$0xff]  ;;  %357 = vmatprep.subr.mxu1 %v130_v3  ;;  %v129_v6 = vld [vmem:[%s501_s2 + $0x10] sm:$0xff] }
   0x4   :  { %348 = vmatprep.subr.mxu0 %v37_v1  ;;  %354 = vmatprep.mubr.msk.f32.mxu0 %vm24_vm0, %v31_v4  ;;  %v35_v7 = vld [vmem:[%s500_s1] sm:$0xff]  ;;  %v128_v8 = vld [vmem:[%s501_s2 + $0x8] sm:$0xff]  ;;  %v215_v10 = vld [vmem:[%s503_s3 + $0x18] sm:$0xff] }
   0x5   :  { %349 = vmatpush3.msra.mxu0 %v37_v1  ;;  %358 = vmatpush3.msra.mxu1 %v130_v3  ;;  %v32_v9 = vld [vmem:[%s502_s0 + $0x8] sm:$0xff]  ;;  %v127_v11 = vld [vmem:[%s501_s2] sm:$0xff]  ;;  %v214_v12 = vld [vmem:[%s503_s3 + $0x10] sm:$0xff] }
   0x6   :  { %350 = vmatprep.subr.mxu0 %v36_v5  ;;  %359 = vmatprep.subr.mxu1 %v129_v6  ;;  %v213_v13 = vld [vmem:[%s503_s3 + $0x8] sm:$0xff]  ;;  %v212_v14 = vld [vmem:[%s503_s3] sm:$0xff] }
   0x7   :  { %351 = vmatpush3.msra.mxu0 %v36_v5  ;;  %360 = vmatpush3.msra.mxu1 %v129_v6 }
   0x8   :  { %352 = vmatprep.subr.mxu0 %v35_v7  ;;  %361 = vmatprep.subr.mxu1 %v128_v8  ;;  %v34_v15 = vld [vmem:[#allocation2 + $0x8] sm:$0xff]  ;;  %v33_v17 = vld [vmem:[#allocation2] sm:$0xff] }
   0x9   :  { %353 = vmatpush3.msra.mxu0 %v35_v7  ;;  %362 = vmatpush3.msra.mxu1 %v128_v8  ;;  %v126_v20 = vld [vmem:[#allocation3 + $0x8] sm:$0xff]  ;;  %v125_v23 = vld [vmem:[#allocation3] sm:$0xff] }
   0xa   :  { %355 = vmatmul.mubr.msk.f32.vlgmr.msra.gmra.mxu0 %vm24_vm0, %v32_v9  ;;  %368 = vmatprep.subr.mxu0 %v215_v10  ;;  %v211_v26 = vld [vmem:[#allocation4 + $0x8] sm:$0xff]  ;;  %v210_v29 = vld [vmem:[#allocation4] sm:$0xff] }
   0xb   :  { %369 = vmatpush3.msra.mxu0 %v215_v10  ;;  %363 = vmatprep.subr.mxu1 %v127_v11 }
   0xc   :  { %370 = vmatprep.subr.mxu0 %v214_v12  ;;  %364 = vmatpush3.msra.mxu1 %v127_v11 }
   0xd   :  { %371 = vmatpush3.msra.mxu0 %v214_v12  ;;  %365 = vmatprep.mubr.msk.f32.mxu1 %vm24_vm0, %v31_v4 }
   0xe   :  { %372 = vmatprep.subr.mxu0 %v213_v13  ;;  %366 = vmatmul.mubr.msk.f32.vlgmr.msra.gmra.mxu1 %vm24_vm0, %v32_v9 }
   0xf   :  { %373 = vmatpush3.msra.mxu0 %v213_v13  ;;  %376 = vmatprep.mubr.msk.f32.mxu0 %vm24_vm0, %v31_v4 }
  0x10   :  { %374 = vmatprep.subr.mxu0 %v212_v14 }
  0x11   :  { %375 = vmatpush3.msra.mxu0 %v212_v14 }
  0x12   :  { %377 = vmatmul.mubr.msk.f32.vlgmr.msra.gmra.mxu0 %vm24_vm0, %v32_v9 }
  0xca   :  { %v356_v16 = vpop.f32.mrf.mxu0 }
  0xcb   :  { %v122_v18 = vadd.f32 %v356_v16, %v34_v15 }
  0xcc   :  { %v112_v19 = vpop.f32.mrf.mxu0 }
  0xcd   :  { %124 = vst.msk [vmem:[#allocation2 + $0x8] sm:$0xff] %vm24_vm0, %v122_v18  ;;  %v121_v21 = vadd.f32 %v112_v19, %v33_v17 }
  0xce   :  { %v367_v22 = vpop.f32.mrf.mxu1 }
  0xcf   :  { %123 = vst.msk [vmem:[#allocation2] sm:$0xff] %vm24_vm0, %v121_v21  ;;  %v207_v24 = vadd.f32 %v367_v22, %v126_v20 }
  0xd0   :  { %v197_v25 = vpop.f32.mrf.mxu1 }
  0xd1   :  { %209 = vst.msk [vmem:[#allocation3 + $0x8] sm:$0xff] %vm24_vm0, %v207_v24  ;;  %v206_v27 = vadd.f32 %v197_v25, %v125_v23 }
  0xd2   :  { %v378_v28 = vpop.f32.mrf.mxu0 }
  0xd3   :  { %208 = vst.msk [vmem:[#allocation3] sm:$0xff] %vm24_vm0, %v206_v27  ;;  %v292_v30 = vadd.f32 %v378_v28, %v211_v26 }
  0xd4   :  { %v299_v31 = vld [vmem:[#allocation2 + $0x8] sm:$0xff]  ;;  %v282_v32 = vpop.f32.mrf.mxu0 }
  0xd5   :  { %301 = vst.msk [vmem:[%s504_s4 + $0x8] sm:$0xff] %vm24_vm0, %v299_v31  ;;  %294 = vst.msk [vmem:[#allocation4 + $0x8] sm:$0xff] %vm24_vm0, %v292_v30  ;;  %v291_v33 = vadd.f32 %v282_v32, %v210_v29 }
  0xd6   :  { %v298_v34 = vld [vmem:[#allocation2] sm:$0xff] }
  0xd7   :  { %300 = vst.msk [vmem:[%s504_s4] sm:$0xff] %vm24_vm0, %v298_v34  ;;  %293 = vst.msk [vmem:[#allocation4] sm:$0xff] %vm24_vm0, %v291_v33 }
  0xd8   :  { %v303_v35 = vld [vmem:[#allocation3 + $0x8] sm:$0xff] }
  0xd9   :  { %305 = vst.msk [vmem:[%s505_s5 + $0x8] sm:$0xff] %vm24_vm0, %v303_v35 }
  0xda   :  { %v302_v36 = vld [vmem:[#allocation3] sm:$0xff] }
  0xdb   :  { %304 = vst.msk [vmem:[%s505_s5] sm:$0xff] %vm24_vm0, %v302_v36 }
  0xdc   :  { %v307_v37 = vld [vmem:[#allocation4 + $0x8] sm:$0xff] }
  0xdd   :  { %309 = vst.msk [vmem:[%s506_s6 + $0x8] sm:$0xff] %vm24_vm0, %v307_v37 }
  0xde   :  { %v306_v38 = vld [vmem:[#allocation4] sm:$0xff] }
  0xdf   :  { %308 = vst.msk [vmem:[%s506_s6] sm:$0xff] %vm24_vm0, %v306_v38 }

// kernel: parallel_attention_forward.4
= control target key start
LH: loop header
LB: loop body
LE: loop exit
PB: predicated region body
PF: predicated region fallthrough
CT: control target
= control target key end

     0   :  { %vm57_vm0 = vcmask 64512   ;;  %v1904_v0 = vmov 0.0   ;;  %vm1905_vm1 = vmmov 0   ;;  %vm24_vm2 = vcmask 7168   ;;  %s1909_s10 = smov 112   ;;  %s1910_s13 = smov 104   ;;  %s2312_s1 = inlined_call_operand.vmem [shape: f32[2,8,32], index: 1, kind: input, shape index: {}]   ;;  %s2313_s0 = inlined_call_operand.vmem [shape: f32[2,8,32], index: 0, kind: input, shape index: {}]   ;;  %s2314_s3 = inlined_call_operand.vmem [shape: f32[2,1,8], index: 3, kind: input, shape index: {}]   ;;  %s2315_s4 = inlined_call_operand.vmem [shape: f32[4,8,8], index: 4, kind: input, shape index: {}]   ;;  %s2316_s2 = inlined_call_operand.vmem [shape: f32[2,8,32], index: 2, kind: input, shape index: {}]   ;;  %s2317_s5 = inlined_call_operand.vmem [shape: f32[2,8,32], index: 5, kind: output, shape index: {}]  }
   0x1   :  { %1764 = vmatprep.subr.mxu0 %v1904_v0  ;;  %v1948_v1 = vld [vmem:[%s2312_s1] sm:$0xff]  ;;  %1769 = vmatprep.subr.mxu1 %v1904_v0  ;;  %v1954_v2 = vld [vmem:[%s2312_s1 + $0x8] sm:$0xff]  ;;  %v1906_v5 = vmov -1e+30   ;;  %33 = vst.msk [vmem:[#allocation3] sm:$0xff] %vm24_vm2, %v1904_v0  ;;  %34 = vst.msk [vmem:[#allocation3 + $0x8] sm:$0xff] %vm24_vm2, %v1904_v0  ;;  %v212_v6 = vlaneseq }
   0x2   :  { %1765 = vmatpush3.xpose.msk.msra.mxu0 %vm57_vm0, %v1948_v1  ;;  %1766 = vmatprep.mubr.msk.f32.mxu0 %vm1905_vm1, %v1904_v0  ;;  %v1963_v3 = vld [vmem:[%s2313_s0] sm:$0xff]  ;;  %v1972_v4 = vld [vmem:[%s2313_s0 + $0x8] sm:$0xff]  ;;  %25 = vst.msk [vmem:[#allocation2] sm:$0xff] %vm24_vm2, %v1906_v5  ;;  %26 = vst.msk [vmem:[#allocation2 + $0x8] sm:$0xff] %vm24_vm2, %v1906_v5  ;;  %v1907_v28 = vmov 0   ;;  %vm41_vm3 = vcmask 261120  }
   0x3   :  { %1770 = vmatpush3.xpose.msk.msra.mxu1 %vm57_vm0, %v1954_v2  ;;  %1771 = vmatprep.mubr.msk.f32.mxu1 %vm1905_vm1, %v1904_v0  ;;  %27 = vst.msk [vmem:[#allocation2 + $0x10] sm:$0xff] %vm24_vm2, %v1906_v5  ;;  %28 = vst.msk [vmem:[#allocation2 + $0x18] sm:$0xff] %vm24_vm2, %v1906_v5  ;;  %v44_v7 = vld [vmem:[%s2314_s3] sm:$0x1]  ;;  %v45_v8 = vld [vmem:[%s2314_s3 + $0x1] sm:$0x1] }
   0x4   :  { %1774 = vmatprep.subr.mxu0 %v1904_v0  ;;  %1779 = vmatprep.subr.mxu1 %v1904_v0  ;;  %29 = vst.msk [vmem:[#allocation2 + $0x20] sm:$0xff] %vm24_vm2, %v1906_v5  ;;  %30 = vst.msk [vmem:[#allocation2 + $0x28] sm:$0xff] %vm24_vm2, %v1906_v5  ;;  %v1703_v9 = vadd.f32 -1.0, %v44_v7  ;;  %v213_v10 = vshrl.u32 %v212_v6, 7  ;;  %v1704_v11 = vadd.f32 -1.0, %v45_v8  ;;  %v56_v15 = vld [vmem:[%s2315_s4] sm:$0xff] }
   0x5   :  { %1767 = vmatmul.mubr.msk.f32.vlgmr.msra.gmra.mxu0 %vm57_vm0, %v1963_v3  ;;  %31 = vst.msk [vmem:[#allocation2 + $0x30] sm:$0xff] %vm24_vm2, %v1906_v5  ;;  %32 = vst.msk [vmem:[#allocation2 + $0x38] sm:$0xff] %vm24_vm2, %v1906_v5  ;;  %1854 = vset.pattern.permute.xlu1 %v1907_v28  ;;  %s1908_s3 = smov 120   ;;  %v2050_v37 = vld [vmem:[%s2316_s2] sm:$0xff]  ;;  %v2061_v38 = vld [vmem:[%s2316_s2 + $0x8] sm:$0xff]  ;;  %s1912_s16 = smov 16  }
   0x6   :  { %1772 = vmatmul.mubr.msk.f32.vlgmr.msra.gmra.mxu1 %vm57_vm0, %v1972_v4  ;;  %1776 = vmatprep.mubr.msk.f32.mxu0 %vm1905_vm1, %v1904_v0  ;;  %35 = vst.msk [vmem:[#allocation3 + $0x10] sm:$0xff] %vm24_vm2, %v1904_v0  ;;  %36 = vst.msk [vmem:[#allocation3 + $0x18] sm:$0xff] %vm24_vm2, %v1904_v0  ;;  %v48_v12 = vmul.f32 10000.0, %v1703_v9  ;;  %v214_v13 = vsub.s32 0, %v213_v10  ;;  %v49_v14 = vmul.f32 10000.0, %v1704_v11  ;;  %v1711_v53 = vld [vmem:[%s2315_s4 + $0x8] sm:$0xff] }
   0x7   :  { %1781 = vmatprep.mubr.msk.f32.mxu1 %vm1905_vm1, %v1904_v0  ;;  %37 = vst.msk [vmem:[#allocation3 + $0x20] sm:$0xff] %vm24_vm2, %v1904_v0  ;;  %38 = vst.msk [vmem:[#allocation3 + $0x28] sm:$0xff] %vm24_vm2, %v1904_v0  ;;  %1855 = vset.pattern.permute.xlu0 %v1907_v28  ;;  %s1913_s17 = smov 24   ;;  %vm1607_vm4 = vcmask 130048   ;;  %vm1610_vm5 = vcmask 195584  }
   0x8   :  { %39 = vst.msk [vmem:[#allocation3 + $0x30] sm:$0xff] %vm24_vm2, %v1904_v0  ;;  %40 = vst.msk [vmem:[#allocation3 + $0x38] sm:$0xff] %vm24_vm2, %v1904_v0  ;;  %v2017_v16 = vrot.slane %v48_v12, %v214_v13  ;;  %v2019_v18 = vrot.slane %v49_v14, %v214_v13  ;;  %1775 = vmatpush3.msra.mxu0 %v2050_v37  ;;  %1780 = vmatpush3.msra.mxu1 %v2061_v38 }
   0x9   :  { %v2027_v29 = vld [vmem:[#allocation2] sm:$0xff]  ;;  %v2032_v32 = vld [vmem:[#allocation2 + $0x8] sm:$0xff]  ;;  %1784 = vmatprep.subr.mxu0 %v1904_v0  ;;  %1789 = vmatprep.subr.mxu1 %v1904_v0  ;;  %42 = vst.msk [vmem:[#allocation4] sm:$0xff] %vm41_vm3, %v1904_v0  ;;  %43 = vst.msk [vmem:[#allocation4 + $0x8] sm:$0xff] %vm41_vm3, %v1904_v0 }
   0xa   :  { %v2100_v7 = vld [vmem:[#allocation2 + $0x10] sm:$0xff]  ;;  %v2105_v10 = vld [vmem:[#allocation2 + $0x18] sm:$0xff] }
  0xc5   :  { %v130_v17 = vpop.f32.mrf.mxu0 }
  0xc6   :  { %v131_v19 = vadd.f32 %v130_v17, %v56_v15  ;;  %v206_v20 = vpop.f32.mrf.mxu1 }
  0xc7   :  { %v1768_v21 = vpop.f32.mrf.mxu0  ;;  %v207_v22 = vadd.f32 %v206_v20, %v56_v15 }
  0xc8   :  { %v1773_v23 = vpop.f32.mrf.mxu1  ;;  %v222_v24 = vadd.f32 %v2017_v16, %v131_v19 }
  0xc9   :  { %v223_v25 = vadd.f32 %v2019_v18, %v207_v22 }
  0xca   :  { %v226_v26 = vsel %vm57_vm0, %v222_v24, -inf }
  0xcb   :  { %227 = vmax.xlane.f32.xlu0 %v226_v26  ;;  %v229_v27 = vsel %vm57_vm0, %v223_v25, -inf }
  0xcf   :  { %230 = vmax.xlane.f32.xlu0 %v229_v27 }
  0xe5   :  { %441 = vrot.lane.b32.xlu0 %v1948_v1, %s1908_s3 }
 0x154   :  { %v228_v30 = vpop.xlane.xlu0 %227 }
 0x155   :  { %v2030_v31 = vmax.f32 %v2027_v29, %v228_v30 }
 0x157   :  { %v234_v33 = vsub.f32 %v2027_v29, %v2030_v31  ;;  %271 = vst.msk [vmem:[#allocation2] sm:$0xff] %vm24_vm2, %v2030_v31  ;;  %242 = vperm.xlu1 %1854, %v2030_v31  }
 0x158   :  { %v231_v34 = vpop.xlane.xlu0 %230 }
 0x159   :  { %v2040_v35 = vmax.f32 %v2032_v32, %v231_v34 }
 0x15b   :  { %v235_v36 = vsub.f32 %v2032_v32, %v2040_v35  ;;  %272 = vst.msk [vmem:[#allocation2 + $0x8] sm:$0xff] %vm24_vm2, %v2040_v35  ;;  %247 = vperm.xlu1 %1854, %v2040_v35   ;;  %v236_v35 = vmul.f32 1.442695, %v234_v33  ;;  %v256_v33 = vld [vmem:[#allocation3] sm:$0xff] }
 0x15c   :  { %v442_v46 = vpop.permute.xlu0 %441 }
 0x15f   :  { %521 = vrot.lane.b32.xlu1 %v1954_v2, %s1908_s3 }
 0x163   :  { %438 = vrot.lane.b32.xlu1 %v1963_v3, %s1908_s3 }
 0x167   :  { %518 = vrot.lane.b32.xlu1 %v1972_v4, %s1908_s3 }
 0x1d2   :  { %v243_v39 = vpop.permute.xlu1 %242 }
 0x1d3   :  { %v250_v40 = vsub.f32 %v222_v24, %v243_v39 }
 0x1d5   :  { %v252_v41 = vmul.f32 1.442695, %v250_v40 }
 0x1d6   :  { %v248_v42 = vpop.permute.xlu1 %247 }
 0x1d7   :  { %1856 = vpow2.f32 %v252_v41  ;;  %v251_v43 = vsub.f32 %v223_v25, %v248_v42  ;;  %v1718_v41 = vld [vmem:[%s2315_s4 + $0x10] sm:$0xff] }
 0x1d9   :  { %v254_v44 = vmul.f32 1.442695, %v251_v43 }
 0x1da   :  { %v522_v45 = vpop.permute.xlu1 %521 }
 0x1db   :  { %1858 = vpow2.f32 %v254_v44 }
 0x1de   :  { %v439_v48 = vpop.permute.xlu1 %438 }
 0x1e2   :  { %v519_v50 = vpop.permute.xlu1 %518 }
 0x1e4   :  { %v2067_v47 = vpop.eup %1856 }
 0x1e5   :  { %1777 = vmatmul.mubr.msk.f32.vlgmr.msra.gmra.mxu0 %vm57_vm0, %v2067_v47 }
 0x1e6   :  { %1785 = vmatpush3.xpose.msk.msra.mxu0 %vm57_vm0, %v442_v46  ;;  %1786 = vmatprep.mubr.msk.f32.mxu0 %vm1905_vm1, %v1904_v0 }
 0x1e7   :  { %1794 = vmatprep.subr.mxu0 %v1904_v0 }
 0x1e8   :  { %v2075_v49 = vpop.eup %1858 }
 0x1e9   :  { %1782 = vmatmul.mubr.msk.f32.vlgmr.msra.gmra.mxu1 %vm57_vm0, %v2075_v49  ;;  %1787 = vmatmul.mubr.msk.f32.vlgmr.msra.gmra.mxu0 %vm57_vm0, %v439_v48 }
 0x1ea   :  { %1790 = vmatpush3.xpose.msk.msra.mxu1 %vm57_vm0, %v522_v45  ;;  %1791 = vmatprep.mubr.msk.f32.mxu1 %vm1905_vm1, %v1904_v0 }
 0x1eb   :  { %1799 = vmatprep.subr.mxu1 %v1904_v0  ;;  %1796 = vmatprep.mubr.msk.f32.mxu0 %vm1905_vm1, %v1904_v0 }
 0x1ed   :  { %1792 = vmatmul.mubr.msk.f32.vlgmr.msra.gmra.mxu1 %vm57_vm0, %v519_v50 }
 0x1ee   :  { %1801 = vmatprep.mubr.msk.f32.mxu1 %vm1905_vm1, %v1904_v0 }
 0x2a5   :  { %v2089_v51 = vpop.f32.mrf.mxu0 }
 0x2a7   :  { %v1778_v52 = vpop.f32.mrf.mxu0 }
 0x2a9   :  { %v2094_v54 = vpop.f32.mrf.mxu1  ;;  %v513_v55 = vpop.f32.mrf.mxu0 }
 0x2aa   :  { %v514_v56 = vadd.f32 %v1711_v53, %v513_v55 }
 0x2ab   :  { %v1783_v57 = vpop.f32.mrf.mxu1  ;;  %v1788_v58 = vpop.f32.mrf.mxu0 }
 0x2ac   :  { %v597_v59 = vadd.f32 %v514_v56, %v2017_v16  ;;  %v2167_v58 = vld [vmem:[#allocation2 + $0x20] sm:$0xff] }
 0x2ad   :  { %v593_v60 = vpop.f32.mrf.mxu1 }
 0x2ae   :  { %v594_v61 = vadd.f32 %v1711_v53, %v593_v60  ;;  %v602_v62 = vsel %vm57_vm0, %v597_v59, -inf }
 0x2af   :  { %v1793_v63 = vpop.f32.mrf.mxu1  ;;  %603 = vmax.xlane.f32.xlu1 %v602_v62 }
 0x2b0   :  { %v598_v5 = vadd.f32 %v594_v61, %v2019_v18  ;;  %v2172_v61 = vld [vmem:[#allocation2 + $0x28] sm:$0xff] }
 0x2b2   :  { %v605_v6 = vsel %vm57_vm0, %v598_v5, -inf }
 0x2b3   :  { %606 = vmax.xlane.f32.xlu0 %v605_v6 }
 0x338   :  { %v604_v8 = vpop.xlane.xlu1 %603 }
 0x339   :  { %v2103_v9 = vmax.f32 %v2100_v7, %v604_v8 }
 0x33b   :  { %v610_v11 = vsub.f32 %v2100_v7, %v2103_v9  ;;  %647 = vst.msk [vmem:[#allocation2 + $0x10] sm:$0xff] %vm24_vm2, %v2103_v9  ;;  %618 = vperm.xlu1 %1854, %v2103_v9  }
 0x33c   :  { %v607_v12 = vpop.xlane.xlu0 %606 }
 0x33d   :  { %v2113_v13 = vmax.f32 %v2105_v10, %v607_v12 }
 0x33f   :  { %v611_v14 = vsub.f32 %v2105_v10, %v2113_v13  ;;  %648 = vst.msk [vmem:[#allocation2 + $0x18] sm:$0xff] %vm24_vm2, %v2113_v13  ;;  %623 = vperm.xlu0 %1855, %v2113_v13   ;;  %650 = vrot.lane.b32.xlu1 %v2050_v37, %s1908_s3 }
 0x341   :  { %v614_v32 = vmul.f32 1.442695, %v611_v14 }
 0x343   :  { %727 = vrot.lane.b32.xlu1 %v2061_v38, %s1908_s3 }
 0x347   :  { %825 = vrot.lane.b32.xlu1 %v1948_v1, %s1909_s10 }
 0x34b   :  { %905 = vrot.lane.b32.xlu1 %v1954_v2, %s1909_s10 }
 0x34f   :  { %822 = vrot.lane.b32.xlu1 %v1963_v3, %s1909_s10 }
 0x353   :  { %902 = vrot.lane.b32.xlu1 %v1972_v4, %s1909_s10 }
 0x3b6   :  { %v619_v15 = vpop.permute.xlu1 %618 }
 0x3b7   :  { %v626_v17 = vsub.f32 %v597_v59, %v619_v15 }
 0x3b9   :  { %v628_v19 = vmul.f32 1.442695, %v626_v17 }
 0x3ba   :  { %v624_v20 = vpop.permute.xlu0 %623  ;;  %v651_v21 = vpop.permute.xlu1 %650 }
 0x3bb   :  { %1860 = vpow2.f32 %v628_v19  ;;  %v627_v22 = vsub.f32 %v598_v5, %v624_v20  ;;  %1795 = vmatpush3.msra.mxu0 %v651_v21 }
 0x3bc   :  { %1804 = vmatprep.subr.mxu0 %v1904_v0 }
 0x3bd   :  { %v630_v23 = vmul.f32 1.442695, %v627_v22 }
 0x3be   :  { %v728_v24 = vpop.permute.xlu1 %727 }
 0x3bf   :  { %1862 = vpow2.f32 %v630_v23  ;;  %1800 = vmatpush3.msra.mxu1 %v728_v24 }
 0x3c0   :  { %1809 = vmatprep.subr.mxu1 %v1904_v0 }
 0x3c2   :  { %v826_v25 = vpop.permute.xlu1 %825 }
 0x3c6   :  { %v906_v26 = vpop.permute.xlu1 %905 }
 0x3c8   :  { %v2134_v27 = vpop.eup %1860 }
 0x3c9   :  { %1797 = vmatmul.mubr.msk.f32.vlgmr.msra.gmra.mxu0 %vm57_vm0, %v2134_v27 }
 0x3ca   :  { %1805 = vmatpush3.xpose.msk.msra.mxu0 %vm57_vm0, %v826_v25  ;;  %1806 = vmatprep.mubr.msk.f32.mxu0 %vm1905_vm1, %v1904_v0  ;;  %v823_v28 = vpop.permute.xlu1 %822 }
 0x3cb   :  { %1814 = vmatprep.subr.mxu0 %v1904_v0 }
 0x3cc   :  { %v2142_v30 = vpop.eup %1862 }
 0x3cd   :  { %1802 = vmatmul.mubr.msk.f32.vlgmr.msra.gmra.mxu1 %vm57_vm0, %v2142_v30  ;;  %1807 = vmatmul.mubr.msk.f32.vlgmr.msra.gmra.mxu0 %vm57_vm0, %v823_v28  ;;  %v1725_v28 = vld [vmem:[%s2315_s4 + $0x18] sm:$0xff]  ;;  %s1911_s4 = smov 8  }
 0x3ce   :  { %1810 = vmatpush3.xpose.msk.msra.mxu1 %vm57_vm0, %v906_v26  ;;  %1811 = vmatprep.mubr.msk.f32.mxu1 %vm1905_vm1, %v1904_v0  ;;  %v903_v34 = vpop.permute.xlu1 %902 }
 0x3cf   :  { %1816 = vmatprep.mubr.msk.f32.mxu0 %vm1905_vm1, %v1904_v0  ;;  %1819 = vmatprep.subr.mxu1 %v1904_v0 }
 0x3d1   :  { %1812 = vmatmul.mubr.msk.f32.vlgmr.msra.gmra.mxu1 %vm57_vm0, %v903_v34 }
 0x3d2   :  { %1821 = vmatprep.mubr.msk.f32.mxu1 %vm1905_vm1, %v1904_v0 }
 0x489   :  { %v2156_v39 = vpop.f32.mrf.mxu0 }
 0x48b   :  { %v1798_v40 = vpop.f32.mrf.mxu0 }
 0x48d   :  { %v2161_v42 = vpop.f32.mrf.mxu1  ;;  %v897_v43 = vpop.f32.mrf.mxu0 }
 0x48e   :  { %v898_v44 = vadd.f32 %v1718_v41, %v897_v43 }
 0x48f   :  { %v1803_v45 = vpop.f32.mrf.mxu1  ;;  %v1808_v46 = vpop.f32.mrf.mxu0 }
 0x490   :  { %v981_v48 = vadd.f32 %v898_v44, %v2017_v16 }
 0x491   :  { %v977_v50 = vpop.f32.mrf.mxu1 }
 0x492   :  { %v978_v52 = vadd.f32 %v1718_v41, %v977_v50  ;;  %v986_v53 = vsel %vm57_vm0, %v981_v48, -inf }
 0x493   :  { %v1813_v55 = vpop.f32.mrf.mxu1  ;;  %987 = vmax.xlane.f32.xlu1 %v986_v53 }
 0x494   :  { %v982_v56 = vadd.f32 %v978_v52, %v2019_v18 }
 0x496   :  { %v989_v57 = vsel %vm57_vm0, %v982_v56, -inf }
 0x497   :  { %990 = vmax.xlane.f32.xlu0 %v989_v57 }
 0x51c   :  { %v988_v59 = vpop.xlane.xlu1 %987 }
 0x51d   :  { %v2170_v60 = vmax.f32 %v2167_v58, %v988_v59 }
 0x51f   :  { %v994_v62 = vsub.f32 %v2167_v58, %v2170_v60  ;;  %1031 = vst.msk [vmem:[#allocation2 + $0x20] sm:$0xff] %vm24_vm2, %v2170_v60  ;;  %1002 = vperm.xlu1 %1854, %v2170_v60  }
 0x520   :  { %v991_v63 = vpop.xlane.xlu0 %990 }
 0x521   :  { %v2180_v5 = vmax.f32 %v2172_v61, %v991_v63  ;;  %v1369_v63 = vld [vmem:[#allocation2 + $0x38] sm:$0xff] }
 0x523   :  { %v995_v6 = vsub.f32 %v2172_v61, %v2180_v5  ;;  %1032 = vst.msk [vmem:[#allocation2 + $0x28] sm:$0xff] %vm24_vm2, %v2180_v5  ;;  %1007 = vperm.xlu0 %1855, %v2180_v5   ;;  %1034 = vrot.lane.b32.xlu1 %v2050_v37, %s1909_s10 }
 0x525   :  { %v998_v7 = vmul.f32 1.442695, %v995_v6  ;;  %v257_v6 = vld [vmem:[#allocation3 + $0x8] sm:$0xff] }
 0x527   :  { %1209 = vrot.lane.b32.xlu0 %v1948_v1, %s1910_s13  ;;  %1111 = vrot.lane.b32.xlu1 %v2061_v38, %s1909_s10 }
 0x52b   :  { %1206 = vrot.lane.b32.xlu0 %v1963_v3, %s1910_s13  ;;  %1289 = vrot.lane.b32.xlu1 %v1954_v2, %s1910_s13 }
 0x52f   :  { %1286 = vrot.lane.b32.xlu1 %v1972_v4, %s1910_s13 }
 0x59a   :  { %v1003_v8 = vpop.permute.xlu1 %1002 }
 0x59b   :  { %v1010_v12 = vsub.f32 %v981_v48, %v1003_v8 }
 0x59d   :  { %v1012_v15 = vmul.f32 1.442695, %v1010_v12 }
 0x59e   :  { %v1008_v17 = vpop.permute.xlu0 %1007  ;;  %v1035_v19 = vpop.permute.xlu1 %1034 }
 0x59f   :  { %1864 = vpow2.f32 %v1012_v15  ;;  %v1011_v20 = vsub.f32 %v982_v56, %v1008_v17  ;;  %1815 = vmatpush3.msra.mxu0 %v1035_v19  ;;  %v1368_v56 = vld [vmem:[#allocation2 + $0x30] sm:$0xff]  ;;  %v263_v17 = vsel %vm57_vm0, %v2075_v49, 0.0  ;;  %v637_v19 = vsel %vm57_vm0, %v2134_v27, 0.0 }
 0x5a0   :  { %1824 = vmatprep.subr.mxu0 %v1904_v0 }
 0x5a1   :  { %v1014_v1 = vmul.f32 1.442695, %v1011_v20  ;;  %v640_v20 = vsel %vm57_vm0, %v2142_v30, 0.0 }
 0x5a2   :  { %v1112_v21 = vpop.permute.xlu1 %1111  ;;  %v1210_v2 = vpop.permute.xlu0 %1209 }
 0x5a3   :  { %1866 = vpow2.f32 %v1014_v1  ;;  %1820 = vmatpush3.msra.mxu1 %v1112_v21 }
 0x5a4   :  { %1829 = vmatprep.subr.mxu1 %v1904_v0 }
 0x5a6   :  { %v1290_v22 = vpop.permute.xlu1 %1289  ;;  %v1207_v4 = vpop.permute.xlu0 %1206 }
 0x5aa   :  { %v1287_v24 = vpop.permute.xlu1 %1286 }
 0x5ac   :  { %v1865_v3 = vpop.eup %1864 }
 0x5ad   :  { %1817 = vmatmul.mubr.msk.f32.vlgmr.msra.gmra.mxu0 %vm57_vm0, %v1865_v3 }
 0x5ae   :  { %1825 = vmatpush3.xpose.msk.msra.mxu0 %vm57_vm0, %v1210_v2  ;;  %1826 = vmatprep.mubr.msk.f32.mxu0 %vm1905_vm1, %v1904_v0 }
 0x5af   :  { %1834 = vmatprep.subr.mxu0 %v1904_v0 }
 0x5b0   :  { %v1867_v23 = vpop.eup %1866 }
 0x5b1   :  { %1822 = vmatmul.mubr.msk.f32.vlgmr.msra.gmra.mxu1 %vm57_vm0, %v1867_v23  ;;  %1827 = vmatmul.mubr.msk.f32.vlgmr.msra.gmra.mxu0 %vm57_vm0, %v1207_v4 }
 0x5b2   :  { %1830 = vmatpush3.xpose.msk.msra.mxu1 %vm57_vm0, %v1290_v22  ;;  %1831 = vmatprep.mubr.msk.f32.mxu1 %vm1905_vm1, %v1904_v0 }
 0x5b3   :  { %1836 = vmatprep.mubr.msk.f32.mxu0 %vm1905_vm1, %v1904_v0  ;;  %1839 = vmatprep.subr.mxu1 %v1904_v0 }
 0x5b5   :  { %1832 = vmatmul.mubr.msk.f32.vlgmr.msra.gmra.mxu1 %vm57_vm0, %v1287_v24 }
 0x5b6   :  { %1841 = vmatprep.mubr.msk.f32.mxu1 %vm1905_vm1, %v1904_v0 }
 0x66d   :  { %v2217_v25 = vpop.f32.mrf.mxu0 }
 0x66f   :  { %v1818_v26 = vpop.f32.mrf.mxu0 }
 0x670   :  { %v612_v26 = vmul.f32 1.442695, %v610_v11 }
 0x671   :  { %v2222_v34 = vpop.f32.mrf.mxu1  ;;  %v1281_v40 = vpop.f32.mrf.mxu0 }
 0x672   :  { %v1282_v41 = vadd.f32 %v1725_v28, %v1281_v40 }
 0x673   :  { %v1823_v43 = vpop.f32.mrf.mxu1  ;;  %v1828_v44 = vpop.f32.mrf.mxu0 }
 0x674   :  { %v1365_v45 = vadd.f32 %v1282_v41, %v2017_v16  ;;  %v633_v43 = vld [vmem:[#allocation3 + $0x10] sm:$0xff] }
 0x675   :  { %v1361_v46 = vpop.f32.mrf.mxu1 }
 0x676   :  { %v1362_v48 = vadd.f32 %v1725_v28, %v1361_v46  ;;  %v1370_v50 = vsel %vm57_vm0, %v1365_v45, -inf }
 0x677   :  { %v1833_v52 = vpop.f32.mrf.mxu1  ;;  %1371 = vmax.xlane.f32.xlu0 %v1370_v50  ;;  %v634_v50 = vld [vmem:[#allocation3 + $0x18] sm:$0xff] }
 0x678   :  { %v1366_v53 = vadd.f32 %v1362_v48, %v2019_v18  ;;  %v260_v18 = vsel %vm57_vm0, %v2067_v47, 0.0 }
 0x67a   :  { %v1373_v55 = vsel %vm57_vm0, %v1366_v53, -inf }
 0x67b   :  { %1374 = vmax.xlane.f32.xlu1 %v1373_v55 }
 0x700   :  { %v1372_v57 = vpop.xlane.xlu0 %1371 }
 0x701   :  { %v1376_v59 = vmax.f32 %v1368_v56, %v1372_v57 }
 0x703   :  { %v1378_v8 = vsub.f32 %v1368_v56, %v1376_v59  ;;  %1415 = vst.msk [vmem:[#allocation2 + $0x30] sm:$0xff] %vm24_vm2, %v1376_v59  ;;  %1386 = vperm.xlu0 %1855, %v1376_v59   ;;  %v1017_v56 = vld [vmem:[#allocation3 + $0x20] sm:$0xff] }
 0x704   :  { %v1375_v16 = vpop.xlane.xlu1 %1374 }
 0x705   :  { %v1377_v12 = vmax.f32 %v1369_v63, %v1375_v16  ;;  %v1380_v9 = vmul.f32 1.442695, %v1378_v8  ;;  %v1018_v8 = vld [vmem:[#allocation3 + $0x28] sm:$0xff] }
 0x707   :  { %v1379_v15 = vsub.f32 %v1369_v63, %v1377_v12  ;;  %1416 = vst.msk [vmem:[#allocation2 + $0x38] sm:$0xff] %vm24_vm2, %v1377_v12  ;;  %1391 = vperm.xlu1 %1854, %v1377_v12   ;;  %1418 = vrot.lane.b32.xlu0 %v2050_v37, %s1910_s13  ;;  %v1021_v37 = vsel %vm57_vm0, %v1865_v3, 0.0  ;;  %v238_v3 = vmul.f32 1.442695, %v235_v36  ;;  %v996_v36 = vmul.f32 1.442695, %v994_v62 }
 0x709   :  { %v1382_v10 = vmul.f32 1.442695, %v1379_v15 }
 0x70b   :  { %1495 = vrot.lane.b32.xlu1 %v2061_v38, %s1910_s13  ;;  %v1024_v38 = vsel %vm57_vm0, %v1867_v23, 0.0 }
 0x726   :  { %261 = vadd.xlane.f32.xlu0 %v260_v18 }
 0x72f   :  { %264 = vadd.xlane.f32.xlu1 %v263_v17 }
 0x733   :  { %638 = vadd.xlane.f32.xlu1 %v637_v19 }
 0x737   :  { %641 = vadd.xlane.f32.xlu1 %v640_v20 }
 0x73b   :  { %1022 = vadd.xlane.f32.xlu1 %v1021_v37 }
 0x73f   :  { %1025 = vadd.xlane.f32.xlu1 %v1024_v38  ;;  %v1401_v38 = vld [vmem:[#allocation3 + $0x30] sm:$0xff] }
 0x77e   :  { %v1387_v47 = vpop.permute.xlu0 %1386 }
 0x77f   :  { %v1394_v1 = vsub.f32 %v1365_v45, %v1387_v47 }
 0x781   :  { %v1396_v21 = vmul.f32 1.442695, %v1394_v1 }
 0x782   :  { %v1392_v2 = vpop.permute.xlu1 %1391  ;;  %v1419_v49 = vpop.permute.xlu0 %1418 }
 0x783   :  { %1868 = vpow2.f32 %v1396_v21  ;;  %v1395_v22 = vsub.f32 %v1366_v53, %v1392_v2  ;;  %1835 = vmatpush3.msra.mxu0 %v1419_v49  ;;  %v1402_v21 = vld [vmem:[#allocation3 + $0x38] sm:$0xff] }
 0x785   :  { %v1398_v27 = vmul.f32 1.442695, %v1395_v22 }
 0x786   :  { %v1496_v4 = vpop.permute.xlu1 %1495 }
 0x787   :  { %1870 = vpow2.f32 %v1398_v27  ;;  %1840 = vmatpush3.msra.mxu1 %v1496_v4 }
 0x788   :  { %1872 = vpow2.f32 %v238_v3 }
 0x789   :  { %1874 = vpow2.f32 %v612_v26 }
 0x78a   :  { %1876 = vpow2.f32 %v614_v32 }
 0x78b   :  { %1878 = vpow2.f32 %v236_v35 }
 0x78c   :  { %1880 = vpow2.f32 %v996_v36 }
 0x78d   :  { %1882 = vpow2.f32 %v998_v7 }
 0x78e   :  { %1884 = vpow2.f32 %v1380_v9 }
 0x78f   :  { %1886 = vpow2.f32 %v1382_v10 }
 0x790   :  { %v1869_v30 = vpop.eup %1868 }
 0x791   :  { %1837 = vmatmul.mubr.msk.f32.vlgmr.msra.gmra.mxu0 %vm57_vm0, %v1869_v30  ;;  %v1405_v23 = vsel %vm57_vm0, %v1869_v30, 0.0 }
 0x792   :  { %1406 = vadd.xlane.f32.xlu1 %v1405_v23 }
 0x794   :  { %v1871_v24 = vpop.eup %1870 }
 0x795   :  { %1842 = vmatmul.mubr.msk.f32.vlgmr.msra.gmra.mxu1 %vm57_vm0, %v1871_v24  ;;  %v1408_v28 = vsel %vm57_vm0, %v1871_v24, 0.0  ;;  %v1873_v11 = vpop.eup %1872 }
 0x796   :  { %1409 = vadd.xlane.f32.xlu0 %v1408_v28  ;;  %v1875_v13 = vpop.eup %1874  ;;  %v259_v41 = vmul.f32 %v1873_v11, %v257_v6 }
 0x797   :  { %v1877_v29 = vpop.eup %1876  ;;  %v635_v46 = vmul.f32 %v1875_v13, %v633_v43  ;;  %v1619_v43 = vld [vmem:[#allocation4] sm:$0xff] }
 0x798   :  { %v1879_v31 = vpop.eup %1878  ;;  %v636_v53 = vmul.f32 %v1877_v29, %v634_v50 }
 0x799   :  { %v1881_v14 = vpop.eup %1880  ;;  %v258_v58 = vmul.f32 %v1879_v31, %v256_v33 }
 0x79a   :  { %v1883_v60 = vpop.eup %1882  ;;  %v1019_v63 = vmul.f32 %v1881_v14, %v1017_v56  ;;  %v1620_v56 = vld [vmem:[#allocation4 + $0x8] sm:$0xff] }
 0x79b   :  { %v1885_v5 = vpop.eup %1884 }
 0x79c   :  { %v1887_v40 = vpop.eup %1886  ;;  %v1403_v47 = vmul.f32 %v1885_v5, %v1401_v38 }
 0x79d   :  { %v1404_v2 = vmul.f32 %v1887_v40, %v1402_v21 }
 0x7a3   :  { %426 = vperm.xlu1 %1854, %v1873_v11  }
 0x7a7   :  { %805 = vperm.xlu1 %1854, %v1875_v13  }
 0x7ab   :  { %810 = vperm.xlu1 %1854, %v1877_v29  }
 0x7ac   :  { %421 = vperm.xlu0 %1855, %v1879_v31  }
 0x7af   :  { %1189 = vperm.xlu1 %1854, %v1881_v14   ;;  %v262_v61 = vpop.xlane.xlu0 %261 }
 0x7b0   :  { %v266_v62 = vadd.f32 %v262_v61, %v258_v58  ;;  %1194 = vperm.xlu0 %1855, %v1883_v60  }
 0x7b2   :  { %269 = vst.msk [vmem:[#allocation3] sm:$0xff] %vm24_vm2, %v266_v62 }
 0x7b3   :  { %1573 = vperm.xlu1 %1854, %v1885_v5  }
 0x7b7   :  { %1578 = vperm.xlu1 %1854, %v1887_v40  }
 0x7b8   :  { %v265_v0 = vpop.xlane.xlu1 %264 }
 0x7b9   :  { %v267_v44 = vadd.f32 %v265_v0, %v259_v41  ;;  %v1631_v45 = vld [vmem:[#allocation3] sm:$0xff] }
 0x7ba   :  { %1888 = vrcp.f32 %v1631_v45 }
 0x7bb   :  { %270 = vst.msk [vmem:[#allocation3 + $0x8] sm:$0xff] %vm24_vm2, %v267_v44  ;;  %1583 = vrot.lane.b32.xlu1 %v2156_v39, %s1911_s4 }
 0x7bc   :  { %v639_v48 = vpop.xlane.xlu1 %638 }
 0x7bd   :  { %v643_v52 = vadd.f32 %v639_v48, %v635_v46 }
 0x7bf   :  { %645 = vst.msk [vmem:[#allocation3 + $0x10] sm:$0xff] %vm24_vm2, %v643_v52  ;;  %1585 = vrot.lane.b32.xlu1 %v2161_v42, %s1911_s4  ;;  %v1020_v42 = vmul.f32 %v1883_v60, %v1018_v8 }
 0x7c0   :  { %v642_v55 = vpop.xlane.xlu1 %641 }
 0x7c1   :  { %v644_v57 = vadd.f32 %v642_v55, %v636_v53 }
 0x7c2   :  { %v1632_v59 = vld [vmem:[#allocation3 + $0x8] sm:$0xff] }
 0x7c3   :  { %646 = vst.msk [vmem:[#allocation3 + $0x18] sm:$0xff] %vm24_vm2, %v644_v57  ;;  %1591 = vrot.lane.b32.xlu1 %v2217_v25, %s1912_s16  ;;  %1890 = vrcp.f32 %v1632_v59 }
 0x7c4   :  { %v1023_v39 = vpop.xlane.xlu1 %1022 }
 0x7c5   :  { %v1027_v16 = vadd.f32 %v1023_v39, %v1019_v63 }
 0x7c6   :  { %v1645_v12 = vld [vmem:[#allocation3 + $0x10] sm:$0xff] }
 0x7c7   :  { %v1889_v15 = vpop.eup %1888  ;;  %1029 = vst.msk [vmem:[#allocation3 + $0x20] sm:$0xff] %vm24_vm2, %v1027_v16  ;;  %1593 = vrot.lane.b32.xlu1 %v2222_v34, %s1912_s16  ;;  %1892 = vrcp.f32 %v1645_v12 }
 0x7c8   :  { %v1026_v18 = vpop.xlane.xlu1 %1025  ;;  %1637 = vperm.xlu0 %1855, %v1889_v15  }
 0x7c9   :  { %v1028_v17 = vadd.f32 %v1026_v18, %v1020_v42 }
 0x7ca   :  { %v1646_v19 = vld [vmem:[#allocation3 + $0x18] sm:$0xff] }
 0x7cb   :  { %1030 = vst.msk [vmem:[#allocation3 + $0x28] sm:$0xff] %vm24_vm2, %v1028_v17  ;;  %1894 = vrcp.f32 %v1646_v19 }
 0x7ce   :  { %v1659_v27 = vld [vmem:[#allocation3 + $0x20] sm:$0xff] }
 0x7cf   :  { %1896 = vrcp.f32 %v1659_v27 }
 0x7d0   :  { %v1891_v25 = vpop.eup %1890 }
 0x7d1   :  { %1642 = vperm.xlu1 %1854, %v1891_v25  }
 0x7d2   :  { %v1660_v4 = vld [vmem:[#allocation3 + $0x28] sm:$0xff] }
 0x7d3   :  { %1898 = vrcp.f32 %v1660_v4 }
 0x7d4   :  { %v1893_v20 = vpop.eup %1892 }
 0x7d5   :  { %1651 = vperm.xlu0 %1855, %v1893_v20  }
 0x7d8   :  { %v1895_v37 = vpop.eup %1894 }
 0x7d9   :  { %1656 = vperm.xlu1 %1854, %v1895_v37  }
 0x7dc   :  { %v1897_v26 = vpop.eup %1896 }
 0x7e0   :  { %v1899_v35 = vpop.eup %1898 }
 0x81b   :  { %v1407_v1 = vpop.xlane.xlu1 %1406 }
 0x81c   :  { %v1411_v34 = vadd.f32 %v1407_v1, %v1403_v47 }
 0x81e   :  { %1413 = vst.msk [vmem:[#allocation3 + $0x30] sm:$0xff] %vm24_vm2, %v1411_v34 }
 0x81f   :  { %v1410_v49 = vpop.xlane.xlu0 %1409  ;;  %v427_v9 = vpop.permute.xlu1 %426 }
 0x820   :  { %v1412_v22 = vadd.f32 %v1410_v49, %v1404_v2 }
 0x822   :  { %1414 = vst.msk [vmem:[#allocation3 + $0x38] sm:$0xff] %vm24_vm2, %v1412_v22 }
 0x823   :  { %v806_v11 = vpop.permute.xlu1 %805 }
 0x825   :  { %v1673_v30 = vld [vmem:[#allocation3 + $0x30] sm:$0xff] }
 0x826   :  { %1900 = vrcp.f32 %v1673_v30 }
 0x827   :  { %v811_v10 = vpop.permute.xlu1 %810  ;;  %v422_v58 = vpop.permute.xlu0 %421 }
 0x828   :  { %v1613_v6 = vsel %vm57_vm0, %v422_v58, %v806_v11  ;;  %v1614_v45 = vsel %vm57_vm0, %v427_v9, %v811_v10 }
 0x829   :  { %v1674_v3 = vld [vmem:[#allocation3 + $0x38] sm:$0xff] }
 0x82a   :  { %1902 = vrcp.f32 %v1674_v3 }
 0x82b   :  { %v1190_v13 = vpop.permute.xlu1 %1189  ;;  %v1195_v61 = vpop.permute.xlu0 %1194 }
 0x82c   :  { %v1615_v40 = vsel %vm1607_vm4, %v1613_v6, %v1190_v13  ;;  %v1616_v48 = vsel %vm1607_vm4, %v1614_v45, %v1195_v61 }
 0x82f   :  { %v1574_v29 = vpop.permute.xlu1 %1573 }
 0x830   :  { %v1617_v44 = vsel %vm1610_vm5, %v1615_v40, %v1574_v29 }
 0x831   :  { %v1621_v50 = vmul.f32 %v1619_v43, %v1617_v44 }
 0x833   :  { %v1901_v36 = vpop.eup %1900  ;;  %v1579_v31 = vpop.permute.xlu1 %1578 }
 0x834   :  { %v1618_v57 = vsel %vm1610_vm5, %v1616_v48, %v1579_v31 }
 0x835   :  { %v1622_v8 = vmul.f32 %v1620_v56, %v1618_v57 }
 0x837   :  { %v1903_v7 = vpop.eup %1902  ;;  %v1584_v33 = vpop.permute.xlu1 %1583 }
 0x838   :  { %v1605_v46 = vsel %vm57_vm0, %v2089_v51, %v1584_v33 }
 0x83b   :  { %v1586_v14 = vpop.permute.xlu1 %1585 }
 0x83c   :  { %v1606_v39 = vsel %vm57_vm0, %v2094_v54, %v1586_v14 }
 0x83f   :  { %v1592_v60 = vpop.permute.xlu1 %1591 }
 0x840   :  { %v1608_v52 = vsel %vm1607_vm4, %v1605_v46, %v1592_v60 }
 0x843   :  { %v1638_v62 = vpop.permute.xlu0 %1637  ;;  %v1594_v5 = vpop.permute.xlu1 %1593 }
 0x844   :  { %v1609_v16 = vsel %vm1607_vm4, %v1606_v39, %v1594_v5 }
 0x84c   :  { %v1643_v41 = vpop.permute.xlu1 %1642 }
 0x850   :  { %v1652_v0 = vpop.permute.xlu0 %1651 }
 0x851   :  { %v1490_v23 = vpop.f32.mrf.mxu0  ;;  %v1687_v18 = vsel %vm57_vm0, %v1638_v62, %v1652_v0 }
 0x852   :  { %1599 = vrot.lane.b32.xlu0 %v1490_v23, %s1913_s17 }
 0x853   :  { %v1838_v24 = vpop.f32.mrf.mxu0 }
 0x854   :  { %v1657_v53 = vpop.permute.xlu1 %1656 }
 0x855   :  { %v1567_v28 = vpop.f32.mrf.mxu1  ;;  %v1688_v38 = vsel %vm57_vm0, %v1643_v41, %v1657_v53 }
 0x856   :  { %1601 = vrot.lane.b32.xlu1 %v1567_v28, %s1913_s17  ;;  %1665 = vperm.xlu0 %1855, %v1897_v26  }
 0x857   :  { %v1843_v32 = vpop.f32.mrf.mxu1 }
 0x85a   :  { %1670 = vperm.xlu1 %1854, %v1899_v35   ;;  %1679 = vperm.xlu0 %1855, %v1901_v36  }
 0x85e   :  { %1684 = vperm.xlu1 %1854, %v1903_v7  }
 0x8c4   :  { %v1600_v55 = vpop.permute.xlu0 %1599 }
 0x8c5   :  { %v1611_v59 = vsel %vm1610_vm5, %v1608_v52, %v1600_v55 }
 0x8c6   :  { %v1623_v63 = vadd.f32 %v1621_v50, %v1611_v59 }
 0x8c8   :  { %1626 = vst.msk [vmem:[#allocation4] sm:$0xff] %vm41_vm3, %v1623_v63  ;;  %v1602_v51 = vpop.permute.xlu1 %1601 }
 0x8c9   :  { %v1612_v12 = vsel %vm1610_vm5, %v1609_v16, %v1602_v51 }
 0x8ca   :  { %v1624_v15 = vadd.f32 %v1622_v8, %v1612_v12 }
 0x8cc   :  { %1627 = vst.msk [vmem:[#allocation4 + $0x8] sm:$0xff] %vm41_vm3, %v1624_v15 }
 0x8cf   :  { %v1693_v20 = vld [vmem:[#allocation4] sm:$0xff] }
 0x8d1   :  { %v1666_v42 = vpop.permute.xlu0 %1665 }
 0x8d2   :  { %v1689_v17 = vsel %vm1607_vm4, %v1687_v18, %v1666_v42 }
 0x8d3   :  { %v1694_v21 = vld [vmem:[#allocation4 + $0x8] sm:$0xff] }
 0x8d5   :  { %v1671_v19 = vpop.permute.xlu1 %1670  ;;  %v1680_v25 = vpop.permute.xlu0 %1679 }
 0x8d6   :  { %v1691_v54 = vsel %vm1610_vm5, %v1689_v17, %v1680_v25  ;;  %v1690_v47 = vsel %vm1607_vm4, %v1688_v38, %v1671_v19 }
 0x8d7   :  { %v1695_v37 = vmul.f32 %v1693_v20, %v1691_v54 }
 0x8d9   :  { %1697 = vst.msk [vmem:[%s2317_s5] sm:$0xff] %vm41_vm3, %v1695_v37  ;;  %v1685_v1 = vpop.permute.xlu1 %1684 }
 0x8da   :  { %v1692_v34 = vsel %vm1610_vm5, %v1690_v47, %v1685_v1 }
 0x8db   :  { %v1696_v2 = vmul.f32 %v1694_v21, %v1692_v34 }
 0x8dd   :  { %1698 = vst.msk [vmem:[%s2317_s5 + $0x8] sm:$0xff] %vm41_vm3, %v1696_v2 }

</bundles_post_ra>
